<compile_context>
chip_gen: v6e
topology: v6e:2x2x1
jax: 0.10.0
libtpu: 0.0.40
codegen_flags: <defaults>
</compile_context>

<pallas_src>
import functools

import jax
import jax.numpy as jnp
from jax.experimental import pallas as pl
from jax.experimental.pallas import tpu as pltpu


def _round_up(n, m):
    return ((n + m - 1) // m) * m


def _default_use_bf16():
    """bf16 VPU/EUP exists on v6e / v7x; v5e (and older) should stay in f32."""
    try:
        kind = jax.devices()[0].device_kind.lower()
    except Exception:
        return False
    return ("v6" in kind) or ("v7" in kind) or ("7x" in kind)


_SUBLANES = 16                     # dense for f32 (2 x (8,128) tiles) AND packed bf16 (16,128)
_LAYOUT_UNIT = _SUBLANES * 128     # 2048: minimal batch-padding quantum


def _policy_kernel(x_ref, w1_ref, b1_ref, w2T_ref, b2_ref, o_ref, *, compute_dtype):
    # x_ref  : (2, 16, Lt) f32   batch folded onto (sublane=16, lane=Lt), feature-major
    # w1_ref : (32, 2)     f32   PyTorch linear1.weight (resident)
    # b1_ref : (32, 1)     f32
    # w2T_ref: (32, 1)     f32   PyTorch linear2.weight, transposed
    # b2_ref : (1, 1)      f32
    # o_ref  : (16, Lt)    f32   dense output tile (unmasked lane/sublane stores)
    cdt = compute_dtype
    w1 = w1_ref[...].astype(cdt)               # (32, 2)
    b1 = b1_ref[...].astype(cdt)               # (32, 1)
    w2 = w2T_ref[...].astype(cdt)              # (32, 1)
    b2 = b2_ref[...]                           # (1, 1), f32

    x0 = x_ref[0].astype(cdt)                  # (16, Lt)  feature 0, dense
    x1 = x_ref[1].astype(cdt)                  # (16, Lt)  feature 1, dense

    hidden = w1_ref.shape[0]                   # 32, static
    acc = jnp.zeros(o_ref.shape, jnp.float32)  # (16, Lt) f32 accumulator

    # Hidden dim is tiny and static: unroll 32 per-plane chains.
    # Layer 1 (K=2) = VPU broadcast-FMA; tanh on the EUP; layer 2 (N=1) = scalar-
    # weighted accumulate (32-way reduce stays in f32).  MXU / XLU untouched.
    for o in range(hidden):
        h_o = jnp.tanh(w1[o:o + 1, 0:1] * x0
                       + w1[o:o + 1, 1:2] * x1
                       + b1[o:o + 1, :])                      # (16, Lt), compute dtype
        acc = acc + (w2[o:o + 1, :] * h_o).astype(jnp.float32)

    y = acc + b2                                              # (16, Lt) f32
    o_ref[...] = jax.nn.sigmoid(y).astype(o_ref.dtype)        # dense sigmoid + dense store


@functools.partial(jax.jit, static_argnames=("use_bf16", "block_batch"))
def policy_forward(x, w1, b1, w2, b2, *, use_bf16=None, block_batch=32768):
    """Forward pass of Policy: sigmoid(tanh(x @ W1^T + b1) @ W2^T + b2).

    x : (B, 2) float32
    w1: (32, 2), b1: (32,)  -- PyTorch linear1.{weight,bias}
    w2: (1, 32), b2: (1,)   -- PyTorch linear2.{weight,bias}
    Returns (B, 1) float32.
    """
    if use_bf16 is None:
        use_bf16 = _default_use_bf16()
    compute_dtype = jnp.bfloat16 if use_bf16 else jnp.float32

    B = x.shape[0]
    S = _SUBLANES

    # --- tiling: ~block_batch elements per grid step, >=2 (even) steps if possible ---
    L_min = _round_up(pl.cdiv(B, S), 128)                  # lanes needed (multiple of 128)
    lane_cap = max(128, _round_up(block_batch // S, 128))  # 2048 lanes -> 32768 elems/tile
    n_tiles = pl.cdiv(L_min, lane_cap)
    if L_min >= 256:
        n_tiles = max(n_tiles, 2)                          # let v7x use both TensorCores
    if n_tiles > 1 and n_tiles % 2 == 1:
        n_tiles += 1                                       # balance across 2 TCs
    Lt = _round_up(pl.cdiv(L_min, n_tiles), 128)           # lane tile (multiple of 128)
    n_tiles = pl.cdiv(L_min, Lt)
    L = n_tiles * Lt                                       # full tiles only (waste <=128 lanes/tile)
    B_pad = S * L
    grid = (n_tiles,)

    # --- wrapper-side layout plumbing (fuses to one copy under jit) ---
    x_pad = jnp.pad(x.astype(jnp.float32), ((0, B_pad - B), (0, 0)))   # (B_pad, 2), zeros are safe
    x_fold = x_pad.T.reshape(2, S, L)                                  # (2, 16, L) feature-major
    w1_ = w1.astype(jnp.float32)                                       # (32, 2)
    b1_ = b1.astype(jnp.float32).reshape(-1, 1)                        # (32, 1)
    w2T = w2.astype(jnp.float32).T                                     # (32, 1)
    b2_ = b2.astype(jnp.float32).reshape(1, 1)                         # (1, 1)
    H = w1_.shape[0]

    kernel = functools.partial(_policy_kernel, compute_dtype=compute_dtype)

    out = pl.pallas_call(
        kernel,
        out_shape=jax.ShapeDtypeStruct((S, L), jnp.float32),
        grid_spec=pltpu.PrefetchScalarGridSpec(
            num_scalar_prefetch=0,
            grid=grid,
            in_specs=[
                pl.BlockSpec((2, S, Lt), lambda i: (0, 0, i)),  # x tile (batch on sublanes x lanes)
                pl.BlockSpec((H, 2), lambda i: (0, 0)),         # w1 resident
                pl.BlockSpec((H, 1), lambda i: (0, 0)),         # b1 resident
                pl.BlockSpec((H, 1), lambda i: (0, 0)),         # w2^T resident
                pl.BlockSpec((1, 1), lambda i: (0, 0)),         # b2 resident
            ],
            out_specs=pl.BlockSpec((S, Lt), lambda i: (0, i)),
        ),
        compiler_params=pltpu.CompilerParams(
            dimension_semantics=("parallel",),     # batch tiles are independent (v7x: 2 TCs)
            vmem_limit_bytes=32 * 1024 * 1024,     # ample; safe on v5e/v6e/v7x
        ),
    )(x_fold, w1_, b1_, w2T, b2_)

    # Row-major flatten of (16, L) is exactly batch order; slicing off pad is cheap.
    return out.reshape(-1)[:B].reshape(B, 1)


def init_params(key):
    """PyTorch-shaped params; PyTorch default init U(-1/sqrt(fan_in), 1/sqrt(fan_in))."""
    k1, k2, k3, k4 = jax.random.split(key, 4)
    bound1 = 1.0 / jnp.sqrt(2.0)
    bound2 = 1.0 / jnp.sqrt(32.0)
    w1 = jax.random.uniform(k1, (32, 2), jnp.float32, -bound1, bound1)
    b1 = jax.random.uniform(k2, (32,), jnp.float32, -bound1, bound1)
    w2 = jax.random.uniform(k3, (1, 32), jnp.float32, -bound2, bound2)
    b2 = jax.random.uniform(k4, (1,), jnp.float32, -bound2, bound2)
    return w1, b1, w2, b2


if __name__ == "__main__":
    key = jax.random.PRNGKey(0)
    k_x, k_x2, k_p = jax.random.split(key, 3)

    w1, b1, w2, b2 = init_params(k_p)

    def ref_fwd(xv):
        # Same math as the PyTorch forward: y = sigmoid(tanh(x @ W1^T + b1) @ W2^T + b2).
        return jax.nn.sigmoid(jnp.tanh(xv @ w1.T + b1) @ w2.T + b2)

    # Small batch (single tile / single grid step), exact f32 path.
    B = 8
    x = jax.random.normal(k_x, (B, 2), dtype=jnp.float32)
    out = policy_forward(x, w1, b1, w2, b2, use_bf16=False)
    jax.block_until_ready(out)
    assert out.shape == (B, 1)
    assert jnp.allclose(out, ref_fwd(x), atol=1e-5, rtol=1e-5)

    # Larger batch exercising the multi-tile ("parallel") grid path, f32.
    B2 = 4100
    x2 = jax.random.normal(k_x2, (B2, 2), dtype=jnp.float32)
    out2 = policy_forward(x2, w1, b1, w2, b2, use_bf16=False)
    jax.block_until_ready(out2)
    assert out2.shape == (B2, 1)
    assert jnp.allclose(out2, ref_fwd(x2), atol=1e-5, rtol=1e-5)

    # Auto path: bf16 compute on v6e/v7x (looser tolerance), f32 elsewhere.
    out_auto = policy_forward(x, w1, b1, w2, b2)
    jax.block_until_ready(out_auto)
    tol = 2e-2 if _default_use_bf16() else 1e-5
    assert jnp.allclose(out_auto, ref_fwd(x), atol=tol, rtol=tol)

    print("KERNEL_OK")
</pallas_src>

<mosaic_0001>
module attributes {stable_mosaic.version = 11 : i64} {
  func.func @_policy_kernel(%arg0: i32, %arg1: memref<2x16x128xf32, #tpu.memory_space<vmem>>, %arg2: memref<32x2xf32, #tpu.memory_space<vmem>>, %arg3: memref<32x1xf32, #tpu.memory_space<vmem>>, %arg4: memref<32x1xf32, #tpu.memory_space<vmem>>, %arg5: memref<1x1xf32, #tpu.memory_space<vmem>>, %arg6: memref<16x128xf32, #tpu.memory_space<vmem>>) attributes {dimension_semantics = [#tpu.dimension_semantics<parallel>], iteration_bounds = array<i64: 1>, scalar_prefetch = 0 : i64, scratch_operands = 0 : i64, tpu.core_type = #tpu.core_type<tc>, window_params = [{transform_indices = @transform_0, window_bounds = array<i64: 2, 16, 128>}, {pipeline_mode = #tpu.pipeline_mode<synchronous>, transform_indices = @transform_1, window_bounds = array<i64: 32, 2>}, {pipeline_mode = #tpu.pipeline_mode<synchronous>, transform_indices = @transform_2, window_bounds = array<i64: 32, 1>}, {pipeline_mode = #tpu.pipeline_mode<synchronous>, transform_indices = @transform_3, window_bounds = array<i64: 32, 1>}, {pipeline_mode = #tpu.pipeline_mode<synchronous>, transform_indices = @transform_4, window_bounds = array<i64: 1, 1>}, {transform_indices = @transform_5, window_bounds = array<i64: 16, 128>}]} {
    %c0 = arith.constant 0 : index
    %c0_0 = arith.constant 0 : index
    %0 = vector.load %arg2[%c0, %c0_0] : memref<32x2xf32, #tpu.memory_space<vmem>>, vector<32x2xf32>
    %c0_1 = arith.constant 0 : index
    %c0_2 = arith.constant 0 : index
    %1 = vector.load %arg3[%c0_1, %c0_2] : memref<32x1xf32, #tpu.memory_space<vmem>>, vector<32x1xf32>
    %c0_3 = arith.constant 0 : index
    %c0_4 = arith.constant 0 : index
    %2 = vector.load %arg4[%c0_3, %c0_4] : memref<32x1xf32, #tpu.memory_space<vmem>>, vector<32x1xf32>
    %c0_5 = arith.constant 0 : index
    %c0_6 = arith.constant 0 : index
    %3 = vector.load %arg5[%c0_5, %c0_6] : memref<1x1xf32, #tpu.memory_space<vmem>>, vector<1x1xf32>
    %c0_7 = arith.constant 0 : index
    %c0_8 = arith.constant 0 : index
    %c0_9 = arith.constant 0 : index
    %4 = vector.load %arg1[%c0_7, %c0_8, %c0_9] : memref<2x16x128xf32, #tpu.memory_space<vmem>>, vector<1x16x128xf32>
    %5 = vector.shape_cast %4 : vector<1x16x128xf32> to vector<16x128xf32>
    %c1 = arith.constant 1 : index
    %c0_10 = arith.constant 0 : index
    %c0_11 = arith.constant 0 : index
    %6 = vector.load %arg1[%c1, %c0_10, %c0_11] : memref<2x16x128xf32, #tpu.memory_space<vmem>>, vector<1x16x128xf32>
    %7 = vector.shape_cast %6 : vector<1x16x128xf32> to vector<16x128xf32>
    %cst = arith.constant 0.000000e+00 : f32
    %8 = vector.broadcast %cst : f32 to vector<16x128xf32>
    %9 = vector.extract_strided_slice %0 {offsets = [0, 0], sizes = [1, 1], strides = [1, 1]} : vector<32x2xf32> to vector<1x1xf32>
    %10 = vector.broadcast %9 : vector<1x1xf32> to vector<16x128xf32>
    %11 = arith.mulf %10, %5 : vector<16x128xf32>
    %12 = vector.extract_strided_slice %0 {offsets = [0, 1], sizes = [1, 1], strides = [1, 1]} : vector<32x2xf32> to vector<1x1xf32>
    %13 = vector.broadcast %12 : vector<1x1xf32> to vector<16x128xf32>
    %14 = arith.mulf %13, %7 : vector<16x128xf32>
    %15 = arith.addf %11, %14 : vector<16x128xf32>
    %16 = vector.extract_strided_slice %1 {offsets = [0, 0], sizes = [1, 1], strides = [1, 1]} : vector<32x1xf32> to vector<1x1xf32>
    %17 = vector.broadcast %16 : vector<1x1xf32> to vector<16x128xf32>
    %18 = arith.addf %15, %17 : vector<16x128xf32>
    %19 = math.tanh %18 : vector<16x128xf32>
    %20 = vector.extract_strided_slice %2 {offsets = [0, 0], sizes = [1, 1], strides = [1, 1]} : vector<32x1xf32> to vector<1x1xf32>
    %21 = vector.broadcast %20 : vector<1x1xf32> to vector<16x128xf32>
    %22 = arith.mulf %21, %19 : vector<16x128xf32>
    %23 = arith.addf %8, %22 : vector<16x128xf32>
    %24 = vector.extract_strided_slice %0 {offsets = [1, 0], sizes = [1, 1], strides = [1, 1]} : vector<32x2xf32> to vector<1x1xf32>
    %25 = vector.broadcast %24 : vector<1x1xf32> to vector<16x128xf32>
    %26 = arith.mulf %25, %5 : vector<16x128xf32>
    %27 = vector.extract_strided_slice %0 {offsets = [1, 1], sizes = [1, 1], strides = [1, 1]} : vector<32x2xf32> to vector<1x1xf32>
    %28 = vector.broadcast %27 : vector<1x1xf32> to vector<16x128xf32>
    %29 = arith.mulf %28, %7 : vector<16x128xf32>
    %30 = arith.addf %26, %29 : vector<16x128xf32>
    %31 = vector.extract_strided_slice %1 {offsets = [1, 0], sizes = [1, 1], strides = [1, 1]} : vector<32x1xf32> to vector<1x1xf32>
    %32 = vector.broadcast %31 : vector<1x1xf32> to vector<16x128xf32>
    %33 = arith.addf %30, %32 : vector<16x128xf32>
    %34 = math.tanh %33 : vector<16x128xf32>
    %35 = vector.extract_strided_slice %2 {offsets = [1, 0], sizes = [1, 1], strides = [1, 1]} : vector<32x1xf32> to vector<1x1xf32>
    %36 = vector.broadcast %35 : vector<1x1xf32> to vector<16x128xf32>
    %37 = arith.mulf %36, %34 : vector<16x128xf32>
    %38 = arith.addf %23, %37 : vector<16x128xf32>
    %39 = vector.extract_strided_slice %0 {offsets = [2, 0], sizes = [1, 1], strides = [1, 1]} : vector<32x2xf32> to vector<1x1xf32>
    %40 = vector.broadcast %39 : vector<1x1xf32> to vector<16x128xf32>
    %41 = arith.mulf %40, %5 : vector<16x128xf32>
    %42 = vector.extract_strided_slice %0 {offsets = [2, 1], sizes = [1, 1], strides = [1, 1]} : vector<32x2xf32> to vector<1x1xf32>
    %43 = vector.broadcast %42 : vector<1x1xf32> to vector<16x128xf32>
    %44 = arith.mulf %43, %7 : vector<16x128xf32>
    %45 = arith.addf %41, %44 : vector<16x128xf32>
    %46 = vector.extract_strided_slice %1 {offsets = [2, 0], sizes = [1, 1], strides = [1, 1]} : vector<32x1xf32> to vector<1x1xf32>
    %47 = vector.broadcast %46 : vector<1x1xf32> to vector<16x128xf32>
    %48 = arith.addf %45, %47 : vector<16x128xf32>
    %49 = math.tanh %48 : vector<16x128xf32>
    %50 = vector.extract_strided_slice %2 {offsets = [2, 0], sizes = [1, 1], strides = [1, 1]} : vector<32x1xf32> to vector<1x1xf32>
    %51 = vector.broadcast %50 : vector<1x1xf32> to vector<16x128xf32>
    %52 = arith.mulf %51, %49 : vector<16x128xf32>
    %53 = arith.addf %38, %52 : vector<16x128xf32>
    %54 = vector.extract_strided_slice %0 {offsets = [3, 0], sizes = [1, 1], strides = [1, 1]} : vector<32x2xf32> to vector<1x1xf32>
    %55 = vector.broadcast %54 : vector<1x1xf32> to vector<16x128xf32>
    %56 = arith.mulf %55, %5 : vector<16x128xf32>
    %57 = vector.extract_strided_slice %0 {offsets = [3, 1], sizes = [1, 1], strides = [1, 1]} : vector<32x2xf32> to vector<1x1xf32>
    %58 = vector.broadcast %57 : vector<1x1xf32> to vector<16x128xf32>
    %59 = arith.mulf %58, %7 : vector<16x128xf32>
    %60 = arith.addf %56, %59 : vector<16x128xf32>
    %61 = vector.extract_strided_slice %1 {offsets = [3, 0], sizes = [1, 1], strides = [1, 1]} : vector<32x1xf32> to vector<1x1xf32>
    %62 = vector.broadcast %61 : vector<1x1xf32> to vector<16x128xf32>
    %63 = arith.addf %60, %62 : vector<16x128xf32>
    %64 = math.tanh %63 : vector<16x128xf32>
    %65 = vector.extract_strided_slice %2 {offsets = [3, 0], sizes = [1, 1], strides = [1, 1]} : vector<32x1xf32> to vector<1x1xf32>
    %66 = vector.broadcast %65 : vector<1x1xf32> to vector<16x128xf32>
    %67 = arith.mulf %66, %64 : vector<16x128xf32>
    %68 = arith.addf %53, %67 : vector<16x128xf32>
    %69 = vector.extract_strided_slice %0 {offsets = [4, 0], sizes = [1, 1], strides = [1, 1]} : vector<32x2xf32> to vector<1x1xf32>
    %70 = vector.broadcast %69 : vector<1x1xf32> to vector<16x128xf32>
    %71 = arith.mulf %70, %5 : vector<16x128xf32>
    %72 = vector.extract_strided_slice %0 {offsets = [4, 1], sizes = [1, 1], strides = [1, 1]} : vector<32x2xf32> to vector<1x1xf32>
    %73 = vector.broadcast %72 : vector<1x1xf32> to vector<16x128xf32>
    %74 = arith.mulf %73, %7 : vector<16x128xf32>
    %75 = arith.addf %71, %74 : vector<16x128xf32>
    %76 = vector.extract_strided_slice %1 {offsets = [4, 0], sizes = [1, 1], strides = [1, 1]} : vector<32x1xf32> to vector<1x1xf32>
    %77 = vector.broadcast %76 : vector<1x1xf32> to vector<16x128xf32>
    %78 = arith.addf %75, %77 : vector<16x128xf32>
    %79 = math.tanh %78 : vector<16x128xf32>
    %80 = vector.extract_strided_slice %2 {offsets = [4, 0], sizes = [1, 1], strides = [1, 1]} : vector<32x1xf32> to vector<1x1xf32>
    %81 = vector.broadcast %80 : vector<1x1xf32> to vector<16x128xf32>
    %82 = arith.mulf %81, %79 : vector<16x128xf32>
    %83 = arith.addf %68, %82 : vector<16x128xf32>
    %84 = vector.extract_strided_slice %0 {offsets = [5, 0], sizes = [1, 1], strides = [1, 1]} : vector<32x2xf32> to vector<1x1xf32>
    %85 = vector.broadcast %84 : vector<1x1xf32> to vector<16x128xf32>
    %86 = arith.mulf %85, %5 : vector<16x128xf32>
    %87 = vector.extract_strided_slice %0 {offsets = [5, 1], sizes = [1, 1], strides = [1, 1]} : vector<32x2xf32> to vector<1x1xf32>
    %88 = vector.broadcast %87 : vector<1x1xf32> to vector<16x128xf32>
    %89 = arith.mulf %88, %7 : vector<16x128xf32>
    %90 = arith.addf %86, %89 : vector<16x128xf32>
    %91 = vector.extract_strided_slice %1 {offsets = [5, 0], sizes = [1, 1], strides = [1, 1]} : vector<32x1xf32> to vector<1x1xf32>
    %92 = vector.broadcast %91 : vector<1x1xf32> to vector<16x128xf32>
    %93 = arith.addf %90, %92 : vector<16x128xf32>
    %94 = math.tanh %93 : vector<16x128xf32>
    %95 = vector.extract_strided_slice %2 {offsets = [5, 0], sizes = [1, 1], strides = [1, 1]} : vector<32x1xf32> to vector<1x1xf32>
    %96 = vector.broadcast %95 : vector<1x1xf32> to vector<16x128xf32>
    %97 = arith.mulf %96, %94 : vector<16x128xf32>
    %98 = arith.addf %83, %97 : vector<16x128xf32>
    %99 = vector.extract_strided_slice %0 {offsets = [6, 0], sizes = [1, 1], strides = [1, 1]} : vector<32x2xf32> to vector<1x1xf32>
    %100 = vector.broadcast %99 : vector<1x1xf32> to vector<16x128xf32>
    %101 = arith.mulf %100, %5 : vector<16x128xf32>
    %102 = vector.extract_strided_slice %0 {offsets = [6, 1], sizes = [1, 1], strides = [1, 1]} : vector<32x2xf32> to vector<1x1xf32>
    %103 = vector.broadcast %102 : vector<1x1xf32> to vector<16x128xf32>
    %104 = arith.mulf %103, %7 : vector<16x128xf32>
    %105 = arith.addf %101, %104 : vector<16x128xf32>
    %106 = vector.extract_strided_slice %1 {offsets = [6, 0], sizes = [1, 1], strides = [1, 1]} : vector<32x1xf32> to vector<1x1xf32>
    %107 = vector.broadcast %106 : vector<1x1xf32> to vector<16x128xf32>
    %108 = arith.addf %105, %107 : vector<16x128xf32>
    %109 = math.tanh %108 : vector<16x128xf32>
    %110 = vector.extract_strided_slice %2 {offsets = [6, 0], sizes = [1, 1], strides = [1, 1]} : vector<32x1xf32> to vector<1x1xf32>
    %111 = vector.broadcast %110 : vector<1x1xf32> to vector<16x128xf32>
    %112 = arith.mulf %111, %109 : vector<16x128xf32>
    %113 = arith.addf %98, %112 : vector<16x128xf32>
    %114 = vector.extract_strided_slice %0 {offsets = [7, 0], sizes = [1, 1], strides = [1, 1]} : vector<32x2xf32> to vector<1x1xf32>
    %115 = vector.broadcast %114 : vector<1x1xf32> to vector<16x128xf32>
    %116 = arith.mulf %115, %5 : vector<16x128xf32>
    %117 = vector.extract_strided_slice %0 {offsets = [7, 1], sizes = [1, 1], strides = [1, 1]} : vector<32x2xf32> to vector<1x1xf32>
    %118 = vector.broadcast %117 : vector<1x1xf32> to vector<16x128xf32>
    %119 = arith.mulf %118, %7 : vector<16x128xf32>
    %120 = arith.addf %116, %119 : vector<16x128xf32>
    %121 = vector.extract_strided_slice %1 {offsets = [7, 0], sizes = [1, 1], strides = [1, 1]} : vector<32x1xf32> to vector<1x1xf32>
    %122 = vector.broadcast %121 : vector<1x1xf32> to vector<16x128xf32>
    %123 = arith.addf %120, %122 : vector<16x128xf32>
    %124 = math.tanh %123 : vector<16x128xf32>
    %125 = vector.extract_strided_slice %2 {offsets = [7, 0], sizes = [1, 1], strides = [1, 1]} : vector<32x1xf32> to vector<1x1xf32>
    %126 = vector.broadcast %125 : vector<1x1xf32> to vector<16x128xf32>
    %127 = arith.mulf %126, %124 : vector<16x128xf32>
    %128 = arith.addf %113, %127 : vector<16x128xf32>
    %129 = vector.extract_strided_slice %0 {offsets = [8, 0], sizes = [1, 1], strides = [1, 1]} : vector<32x2xf32> to vector<1x1xf32>
    %130 = vector.broadcast %129 : vector<1x1xf32> to vector<16x128xf32>
    %131 = arith.mulf %130, %5 : vector<16x128xf32>
    %132 = vector.extract_strided_slice %0 {offsets = [8, 1], sizes = [1, 1], strides = [1, 1]} : vector<32x2xf32> to vector<1x1xf32>
    %133 = vector.broadcast %132 : vector<1x1xf32> to vector<16x128xf32>
    %134 = arith.mulf %133, %7 : vector<16x128xf32>
    %135 = arith.addf %131, %134 : vector<16x128xf32>
    %136 = vector.extract_strided_slice %1 {offsets = [8, 0], sizes = [1, 1], strides = [1, 1]} : vector<32x1xf32> to vector<1x1xf32>
    %137 = vector.broadcast %136 : vector<1x1xf32> to vector<16x128xf32>
    %138 = arith.addf %135, %137 : vector<16x128xf32>
    %139 = math.tanh %138 : vector<16x128xf32>
    %140 = vector.extract_strided_slice %2 {offsets = [8, 0], sizes = [1, 1], strides = [1, 1]} : vector<32x1xf32> to vector<1x1xf32>
    %141 = vector.broadcast %140 : vector<1x1xf32> to vector<16x128xf32>
    %142 = arith.mulf %141, %139 : vector<16x128xf32>
    %143 = arith.addf %128, %142 : vector<16x128xf32>
    %144 = vector.extract_strided_slice %0 {offsets = [9, 0], sizes = [1, 1], strides = [1, 1]} : vector<32x2xf32> to vector<1x1xf32>
    %145 = vector.broadcast %144 : vector<1x1xf32> to vector<16x128xf32>
    %146 = arith.mulf %145, %5 : vector<16x128xf32>
    %147 = vector.extract_strided_slice %0 {offsets = [9, 1], sizes = [1, 1], strides = [1, 1]} : vector<32x2xf32> to vector<1x1xf32>
    %148 = vector.broadcast %147 : vector<1x1xf32> to vector<16x128xf32>
    %149 = arith.mulf %148, %7 : vector<16x128xf32>
    %150 = arith.addf %146, %149 : vector<16x128xf32>
    %151 = vector.extract_strided_slice %1 {offsets = [9, 0], sizes = [1, 1], strides = [1, 1]} : vector<32x1xf32> to vector<1x1xf32>
    %152 = vector.broadcast %151 : vector<1x1xf32> to vector<16x128xf32>
    %153 = arith.addf %150, %152 : vector<16x128xf32>
    %154 = math.tanh %153 : vector<16x128xf32>
    %155 = vector.extract_strided_slice %2 {offsets = [9, 0], sizes = [1, 1], strides = [1, 1]} : vector<32x1xf32> to vector<1x1xf32>
    %156 = vector.broadcast %155 : vector<1x1xf32> to vector<16x128xf32>
    %157 = arith.mulf %156, %154 : vector<16x128xf32>
    %158 = arith.addf %143, %157 : vector<16x128xf32>
    %159 = vector.extract_strided_slice %0 {offsets = [10, 0], sizes = [1, 1], strides = [1, 1]} : vector<32x2xf32> to vector<1x1xf32>
    %160 = vector.broadcast %159 : vector<1x1xf32> to vector<16x128xf32>
    %161 = arith.mulf %160, %5 : vector<16x128xf32>
    %162 = vector.extract_strided_slice %0 {offsets = [10, 1], sizes = [1, 1], strides = [1, 1]} : vector<32x2xf32> to vector<1x1xf32>
    %163 = vector.broadcast %162 : vector<1x1xf32> to vector<16x128xf32>
    %164 = arith.mulf %163, %7 : vector<16x128xf32>
    %165 = arith.addf %161, %164 : vector<16x128xf32>
    %166 = vector.extract_strided_slice %1 {offsets = [10, 0], sizes = [1, 1], strides = [1, 1]} : vector<32x1xf32> to vector<1x1xf32>
    %167 = vector.broadcast %166 : vector<1x1xf32> to vector<16x128xf32>
    %168 = arith.addf %165, %167 : vector<16x128xf32>
    %169 = math.tanh %168 : vector<16x128xf32>
    %170 = vector.extract_strided_slice %2 {offsets = [10, 0], sizes = [1, 1], strides = [1, 1]} : vector<32x1xf32> to vector<1x1xf32>
    %171 = vector.broadcast %170 : vector<1x1xf32> to vector<16x128xf32>
    %172 = arith.mulf %171, %169 : vector<16x128xf32>
    %173 = arith.addf %158, %172 : vector<16x128xf32>
    %174 = vector.extract_strided_slice %0 {offsets = [11, 0], sizes = [1, 1], strides = [1, 1]} : vector<32x2xf32> to vector<1x1xf32>
    %175 = vector.broadcast %174 : vector<1x1xf32> to vector<16x128xf32>
    %176 = arith.mulf %175, %5 : vector<16x128xf32>
    %177 = vector.extract_strided_slice %0 {offsets = [11, 1], sizes = [1, 1], strides = [1, 1]} : vector<32x2xf32> to vector<1x1xf32>
    %178 = vector.broadcast %177 : vector<1x1xf32> to vector<16x128xf32>
    %179 = arith.mulf %178, %7 : vector<16x128xf32>
    %180 = arith.addf %176, %179 : vector<16x128xf32>
    %181 = vector.extract_strided_slice %1 {offsets = [11, 0], sizes = [1, 1], strides = [1, 1]} : vector<32x1xf32> to vector<1x1xf32>
    %182 = vector.broadcast %181 : vector<1x1xf32> to vector<16x128xf32>
    %183 = arith.addf %180, %182 : vector<16x128xf32>
    %184 = math.tanh %183 : vector<16x128xf32>
    %185 = vector.extract_strided_slice %2 {offsets = [11, 0], sizes = [1, 1], strides = [1, 1]} : vector<32x1xf32> to vector<1x1xf32>
    %186 = vector.broadcast %185 : vector<1x1xf32> to vector<16x128xf32>
    %187 = arith.mulf %186, %184 : vector<16x128xf32>
    %188 = arith.addf %173, %187 : vector<16x128xf32>
    %189 = vector.extract_strided_slice %0 {offsets = [12, 0], sizes = [1, 1], strides = [1, 1]} : vector<32x2xf32> to vector<1x1xf32>
    %190 = vector.broadcast %189 : vector<1x1xf32> to vector<16x128xf32>
    %191 = arith.mulf %190, %5 : vector<16x128xf32>
    %192 = vector.extract_strided_slice %0 {offsets = [12, 1], sizes = [1, 1], strides = [1, 1]} : vector<32x2xf32> to vector<1x1xf32>
    %193 = vector.broadcast %192 : vector<1x1xf32> to vector<16x128xf32>
    %194 = arith.mulf %193, %7 : vector<16x128xf32>
    %195 = arith.addf %191, %194 : vector<16x128xf32>
    %196 = vector.extract_strided_slice %1 {offsets = [12, 0], sizes = [1, 1], strides = [1, 1]} : vector<32x1xf32> to vector<1x1xf32>
    %197 = vector.broadcast %196 : vector<1x1xf32> to vector<16x128xf32>
    %198 = arith.addf %195, %197 : vector<16x128xf32>
    %199 = math.tanh %198 : vector<16x128xf32>
    %200 = vector.extract_strided_slice %2 {offsets = [12, 0], sizes = [1, 1], strides = [1, 1]} : vector<32x1xf32> to vector<1x1xf32>
    %201 = vector.broadcast %200 : vector<1x1xf32> to vector<16x128xf32>
    %202 = arith.mulf %201, %199 : vector<16x128xf32>
    %203 = arith.addf %188, %202 : vector<16x128xf32>
    %204 = vector.extract_strided_slice %0 {offsets = [13, 0], sizes = [1, 1], strides = [1, 1]} : vector<32x2xf32> to vector<1x1xf32>
    %205 = vector.broadcast %204 : vector<1x1xf32> to vector<16x128xf32>
    %206 = arith.mulf %205, %5 : vector<16x128xf32>
    %207 = vector.extract_strided_slice %0 {offsets = [13, 1], sizes = [1, 1], strides = [1, 1]} : vector<32x2xf32> to vector<1x1xf32>
    %208 = vector.broadcast %207 : vector<1x1xf32> to vector<16x128xf32>
    %209 = arith.mulf %208, %7 : vector<16x128xf32>
    %210 = arith.addf %206, %209 : vector<16x128xf32>
    %211 = vector.extract_strided_slice %1 {offsets = [13, 0], sizes = [1, 1], strides = [1, 1]} : vector<32x1xf32> to vector<1x1xf32>
    %212 = vector.broadcast %211 : vector<1x1xf32> to vector<16x128xf32>
    %213 = arith.addf %210, %212 : vector<16x128xf32>
    %214 = math.tanh %213 : vector<16x128xf32>
    %215 = vector.extract_strided_slice %2 {offsets = [13, 0], sizes = [1, 1], strides = [1, 1]} : vector<32x1xf32> to vector<1x1xf32>
    %216 = vector.broadcast %215 : vector<1x1xf32> to vector<16x128xf32>
    %217 = arith.mulf %216, %214 : vector<16x128xf32>
    %218 = arith.addf %203, %217 : vector<16x128xf32>
    %219 = vector.extract_strided_slice %0 {offsets = [14, 0], sizes = [1, 1], strides = [1, 1]} : vector<32x2xf32> to vector<1x1xf32>
    %220 = vector.broadcast %219 : vector<1x1xf32> to vector<16x128xf32>
    %221 = arith.mulf %220, %5 : vector<16x128xf32>
    %222 = vector.extract_strided_slice %0 {offsets = [14, 1], sizes = [1, 1], strides = [1, 1]} : vector<32x2xf32> to vector<1x1xf32>
    %223 = vector.broadcast %222 : vector<1x1xf32> to vector<16x128xf32>
    %224 = arith.mulf %223, %7 : vector<16x128xf32>
    %225 = arith.addf %221, %224 : vector<16x128xf32>
    %226 = vector.extract_strided_slice %1 {offsets = [14, 0], sizes = [1, 1], strides = [1, 1]} : vector<32x1xf32> to vector<1x1xf32>
    %227 = vector.broadcast %226 : vector<1x1xf32> to vector<16x128xf32>
    %228 = arith.addf %225, %227 : vector<16x128xf32>
    %229 = math.tanh %228 : vector<16x128xf32>
    %230 = vector.extract_strided_slice %2 {offsets = [14, 0], sizes = [1, 1], strides = [1, 1]} : vector<32x1xf32> to vector<1x1xf32>
    %231 = vector.broadcast %230 : vector<1x1xf32> to vector<16x128xf32>
    %232 = arith.mulf %231, %229 : vector<16x128xf32>
    %233 = arith.addf %218, %232 : vector<16x128xf32>
    %234 = vector.extract_strided_slice %0 {offsets = [15, 0], sizes = [1, 1], strides = [1, 1]} : vector<32x2xf32> to vector<1x1xf32>
    %235 = vector.broadcast %234 : vector<1x1xf32> to vector<16x128xf32>
    %236 = arith.mulf %235, %5 : vector<16x128xf32>
    %237 = vector.extract_strided_slice %0 {offsets = [15, 1], sizes = [1, 1], strides = [1, 1]} : vector<32x2xf32> to vector<1x1xf32>
    %238 = vector.broadcast %237 : vector<1x1xf32> to vector<16x128xf32>
    %239 = arith.mulf %238, %7 : vector<16x128xf32>
    %240 = arith.addf %236, %239 : vector<16x128xf32>
    %241 = vector.extract_strided_slice %1 {offsets = [15, 0], sizes = [1, 1], strides = [1, 1]} : vector<32x1xf32> to vector<1x1xf32>
    %242 = vector.broadcast %241 : vector<1x1xf32> to vector<16x128xf32>
    %243 = arith.addf %240, %242 : vector<16x128xf32>
    %244 = math.tanh %243 : vector<16x128xf32>
    %245 = vector.extract_strided_slice %2 {offsets = [15, 0], sizes = [1, 1], strides = [1, 1]} : vector<32x1xf32> to vector<1x1xf32>
    %246 = vector.broadcast %245 : vector<1x1xf32> to vector<16x128xf32>
    %247 = arith.mulf %246, %244 : vector<16x128xf32>
    %248 = arith.addf %233, %247 : vector<16x128xf32>
    %249 = vector.extract_strided_slice %0 {offsets = [16, 0], sizes = [1, 1], strides = [1, 1]} : vector<32x2xf32> to vector<1x1xf32>
    %250 = vector.broadcast %249 : vector<1x1xf32> to vector<16x128xf32>
    %251 = arith.mulf %250, %5 : vector<16x128xf32>
    %252 = vector.extract_strided_slice %0 {offsets = [16, 1], sizes = [1, 1], strides = [1, 1]} : vector<32x2xf32> to vector<1x1xf32>
    %253 = vector.broadcast %252 : vector<1x1xf32> to vector<16x128xf32>
    %254 = arith.mulf %253, %7 : vector<16x128xf32>
    %255 = arith.addf %251, %254 : vector<16x128xf32>
    %256 = vector.extract_strided_slice %1 {offsets = [16, 0], sizes = [1, 1], strides = [1, 1]} : vector<32x1xf32> to vector<1x1xf32>
    %257 = vector.broadcast %256 : vector<1x1xf32> to vector<16x128xf32>
    %258 = arith.addf %255, %257 : vector<16x128xf32>
    %259 = math.tanh %258 : vector<16x128xf32>
    %260 = vector.extract_strided_slice %2 {offsets = [16, 0], sizes = [1, 1], strides = [1, 1]} : vector<32x1xf32> to vector<1x1xf32>
    %261 = vector.broadcast %260 : vector<1x1xf32> to vector<16x128xf32>
    %262 = arith.mulf %261, %259 : vector<16x128xf32>
    %263 = arith.addf %248, %262 : vector<16x128xf32>
    %264 = vector.extract_strided_slice %0 {offsets = [17, 0], sizes = [1, 1], strides = [1, 1]} : vector<32x2xf32> to vector<1x1xf32>
    %265 = vector.broadcast %264 : vector<1x1xf32> to vector<16x128xf32>
    %266 = arith.mulf %265, %5 : vector<16x128xf32>
    %267 = vector.extract_strided_slice %0 {offsets = [17, 1], sizes = [1, 1], strides = [1, 1]} : vector<32x2xf32> to vector<1x1xf32>
    %268 = vector.broadcast %267 : vector<1x1xf32> to vector<16x128xf32>
    %269 = arith.mulf %268, %7 : vector<16x128xf32>
    %270 = arith.addf %266, %269 : vector<16x128xf32>
    %271 = vector.extract_strided_slice %1 {offsets = [17, 0], sizes = [1, 1], strides = [1, 1]} : vector<32x1xf32> to vector<1x1xf32>
    %272 = vector.broadcast %271 : vector<1x1xf32> to vector<16x128xf32>
    %273 = arith.addf %270, %272 : vector<16x128xf32>
    %274 = math.tanh %273 : vector<16x128xf32>
    %275 = vector.extract_strided_slice %2 {offsets = [17, 0], sizes = [1, 1], strides = [1, 1]} : vector<32x1xf32> to vector<1x1xf32>
    %276 = vector.broadcast %275 : vector<1x1xf32> to vector<16x128xf32>
    %277 = arith.mulf %276, %274 : vector<16x128xf32>
    %278 = arith.addf %263, %277 : vector<16x128xf32>
    %279 = vector.extract_strided_slice %0 {offsets = [18, 0], sizes = [1, 1], strides = [1, 1]} : vector<32x2xf32> to vector<1x1xf32>
    %280 = vector.broadcast %279 : vector<1x1xf32> to vector<16x128xf32>
    %281 = arith.mulf %280, %5 : vector<16x128xf32>
    %282 = vector.extract_strided_slice %0 {offsets = [18, 1], sizes = [1, 1], strides = [1, 1]} : vector<32x2xf32> to vector<1x1xf32>
    %283 = vector.broadcast %282 : vector<1x1xf32> to vector<16x128xf32>
    %284 = arith.mulf %283, %7 : vector<16x128xf32>
    %285 = arith.addf %281, %284 : vector<16x128xf32>
    %286 = vector.extract_strided_slice %1 {offsets = [18, 0], sizes = [1, 1], strides = [1, 1]} : vector<32x1xf32> to vector<1x1xf32>
    %287 = vector.broadcast %286 : vector<1x1xf32> to vector<16x128xf32>
    %288 = arith.addf %285, %287 : vector<16x128xf32>
    %289 = math.tanh %288 : vector<16x128xf32>
    %290 = vector.extract_strided_slice %2 {offsets = [18, 0], sizes = [1, 1], strides = [1, 1]} : vector<32x1xf32> to vector<1x1xf32>
    %291 = vector.broadcast %290 : vector<1x1xf32> to vector<16x128xf32>
    %292 = arith.mulf %291, %289 : vector<16x128xf32>
    %293 = arith.addf %278, %292 : vector<16x128xf32>
    %294 = vector.extract_strided_slice %0 {offsets = [19, 0], sizes = [1, 1], strides = [1, 1]} : vector<32x2xf32> to vector<1x1xf32>
    %295 = vector.broadcast %294 : vector<1x1xf32> to vector<16x128xf32>
    %296 = arith.mulf %295, %5 : vector<16x128xf32>
    %297 = vector.extract_strided_slice %0 {offsets = [19, 1], sizes = [1, 1], strides = [1, 1]} : vector<32x2xf32> to vector<1x1xf32>
    %298 = vector.broadcast %297 : vector<1x1xf32> to vector<16x128xf32>
    %299 = arith.mulf %298, %7 : vector<16x128xf32>
    %300 = arith.addf %296, %299 : vector<16x128xf32>
    %301 = vector.extract_strided_slice %1 {offsets = [19, 0], sizes = [1, 1], strides = [1, 1]} : vector<32x1xf32> to vector<1x1xf32>
    %302 = vector.broadcast %301 : vector<1x1xf32> to vector<16x128xf32>
    %303 = arith.addf %300, %302 : vector<16x128xf32>
    %304 = math.tanh %303 : vector<16x128xf32>
    %305 = vector.extract_strided_slice %2 {offsets = [19, 0], sizes = [1, 1], strides = [1, 1]} : vector<32x1xf32> to vector<1x1xf32>
    %306 = vector.broadcast %305 : vector<1x1xf32> to vector<16x128xf32>
    %307 = arith.mulf %306, %304 : vector<16x128xf32>
    %308 = arith.addf %293, %307 : vector<16x128xf32>
    %309 = vector.extract_strided_slice %0 {offsets = [20, 0], sizes = [1, 1], strides = [1, 1]} : vector<32x2xf32> to vector<1x1xf32>
    %310 = vector.broadcast %309 : vector<1x1xf32> to vector<16x128xf32>
    %311 = arith.mulf %310, %5 : vector<16x128xf32>
    %312 = vector.extract_strided_slice %0 {offsets = [20, 1], sizes = [1, 1], strides = [1, 1]} : vector<32x2xf32> to vector<1x1xf32>
    %313 = vector.broadcast %312 : vector<1x1xf32> to vector<16x128xf32>
    %314 = arith.mulf %313, %7 : vector<16x128xf32>
    %315 = arith.addf %311, %314 : vector<16x128xf32>
    %316 = vector.extract_strided_slice %1 {offsets = [20, 0], sizes = [1, 1], strides = [1, 1]} : vector<32x1xf32> to vector<1x1xf32>
    %317 = vector.broadcast %316 : vector<1x1xf32> to vector<16x128xf32>
    %318 = arith.addf %315, %317 : vector<16x128xf32>
    %319 = math.tanh %318 : vector<16x128xf32>
    %320 = vector.extract_strided_slice %2 {offsets = [20, 0], sizes = [1, 1], strides = [1, 1]} : vector<32x1xf32> to vector<1x1xf32>
    %321 = vector.broadcast %320 : vector<1x1xf32> to vector<16x128xf32>
    %322 = arith.mulf %321, %319 : vector<16x128xf32>
    %323 = arith.addf %308, %322 : vector<16x128xf32>
    %324 = vector.extract_strided_slice %0 {offsets = [21, 0], sizes = [1, 1], strides = [1, 1]} : vector<32x2xf32> to vector<1x1xf32>
    %325 = vector.broadcast %324 : vector<1x1xf32> to vector<16x128xf32>
    %326 = arith.mulf %325, %5 : vector<16x128xf32>
    %327 = vector.extract_strided_slice %0 {offsets = [21, 1], sizes = [1, 1], strides = [1, 1]} : vector<32x2xf32> to vector<1x1xf32>
    %328 = vector.broadcast %327 : vector<1x1xf32> to vector<16x128xf32>
    %329 = arith.mulf %328, %7 : vector<16x128xf32>
    %330 = arith.addf %326, %329 : vector<16x128xf32>
    %331 = vector.extract_strided_slice %1 {offsets = [21, 0], sizes = [1, 1], strides = [1, 1]} : vector<32x1xf32> to vector<1x1xf32>
    %332 = vector.broadcast %331 : vector<1x1xf32> to vector<16x128xf32>
    %333 = arith.addf %330, %332 : vector<16x128xf32>
    %334 = math.tanh %333 : vector<16x128xf32>
    %335 = vector.extract_strided_slice %2 {offsets = [21, 0], sizes = [1, 1], strides = [1, 1]} : vector<32x1xf32> to vector<1x1xf32>
    %336 = vector.broadcast %335 : vector<1x1xf32> to vector<16x128xf32>
    %337 = arith.mulf %336, %334 : vector<16x128xf32>
    %338 = arith.addf %323, %337 : vector<16x128xf32>
    %339 = vector.extract_strided_slice %0 {offsets = [22, 0], sizes = [1, 1], strides = [1, 1]} : vector<32x2xf32> to vector<1x1xf32>
    %340 = vector.broadcast %339 : vector<1x1xf32> to vector<16x128xf32>
    %341 = arith.mulf %340, %5 : vector<16x128xf32>
    %342 = vector.extract_strided_slice %0 {offsets = [22, 1], sizes = [1, 1], strides = [1, 1]} : vector<32x2xf32> to vector<1x1xf32>
    %343 = vector.broadcast %342 : vector<1x1xf32> to vector<16x128xf32>
    %344 = arith.mulf %343, %7 : vector<16x128xf32>
    %345 = arith.addf %341, %344 : vector<16x128xf32>
    %346 = vector.extract_strided_slice %1 {offsets = [22, 0], sizes = [1, 1], strides = [1, 1]} : vector<32x1xf32> to vector<1x1xf32>
    %347 = vector.broadcast %346 : vector<1x1xf32> to vector<16x128xf32>
    %348 = arith.addf %345, %347 : vector<16x128xf32>
    %349 = math.tanh %348 : vector<16x128xf32>
    %350 = vector.extract_strided_slice %2 {offsets = [22, 0], sizes = [1, 1], strides = [1, 1]} : vector<32x1xf32> to vector<1x1xf32>
    %351 = vector.broadcast %350 : vector<1x1xf32> to vector<16x128xf32>
    %352 = arith.mulf %351, %349 : vector<16x128xf32>
    %353 = arith.addf %338, %352 : vector<16x128xf32>
    %354 = vector.extract_strided_slice %0 {offsets = [23, 0], sizes = [1, 1], strides = [1, 1]} : vector<32x2xf32> to vector<1x1xf32>
    %355 = vector.broadcast %354 : vector<1x1xf32> to vector<16x128xf32>
    %356 = arith.mulf %355, %5 : vector<16x128xf32>
    %357 = vector.extract_strided_slice %0 {offsets = [23, 1], sizes = [1, 1], strides = [1, 1]} : vector<32x2xf32> to vector<1x1xf32>
    %358 = vector.broadcast %357 : vector<1x1xf32> to vector<16x128xf32>
    %359 = arith.mulf %358, %7 : vector<16x128xf32>
    %360 = arith.addf %356, %359 : vector<16x128xf32>
    %361 = vector.extract_strided_slice %1 {offsets = [23, 0], sizes = [1, 1], strides = [1, 1]} : vector<32x1xf32> to vector<1x1xf32>
    %362 = vector.broadcast %361 : vector<1x1xf32> to vector<16x128xf32>
    %363 = arith.addf %360, %362 : vector<16x128xf32>
    %364 = math.tanh %363 : vector<16x128xf32>
    %365 = vector.extract_strided_slice %2 {offsets = [23, 0], sizes = [1, 1], strides = [1, 1]} : vector<32x1xf32> to vector<1x1xf32>
    %366 = vector.broadcast %365 : vector<1x1xf32> to vector<16x128xf32>
    %367 = arith.mulf %366, %364 : vector<16x128xf32>
    %368 = arith.addf %353, %367 : vector<16x128xf32>
    %369 = vector.extract_strided_slice %0 {offsets = [24, 0], sizes = [1, 1], strides = [1, 1]} : vector<32x2xf32> to vector<1x1xf32>
    %370 = vector.broadcast %369 : vector<1x1xf32> to vector<16x128xf32>
    %371 = arith.mulf %370, %5 : vector<16x128xf32>
    %372 = vector.extract_strided_slice %0 {offsets = [24, 1], sizes = [1, 1], strides = [1, 1]} : vector<32x2xf32> to vector<1x1xf32>
    %373 = vector.broadcast %372 : vector<1x1xf32> to vector<16x128xf32>
    %374 = arith.mulf %373, %7 : vector<16x128xf32>
    %375 = arith.addf %371, %374 : vector<16x128xf32>
    %376 = vector.extract_strided_slice %1 {offsets = [24, 0], sizes = [1, 1], strides = [1, 1]} : vector<32x1xf32> to vector<1x1xf32>
    %377 = vector.broadcast %376 : vector<1x1xf32> to vector<16x128xf32>
    %378 = arith.addf %375, %377 : vector<16x128xf32>
    %379 = math.tanh %378 : vector<16x128xf32>
    %380 = vector.extract_strided_slice %2 {offsets = [24, 0], sizes = [1, 1], strides = [1, 1]} : vector<32x1xf32> to vector<1x1xf32>
    %381 = vector.broadcast %380 : vector<1x1xf32> to vector<16x128xf32>
    %382 = arith.mulf %381, %379 : vector<16x128xf32>
    %383 = arith.addf %368, %382 : vector<16x128xf32>
    %384 = vector.extract_strided_slice %0 {offsets = [25, 0], sizes = [1, 1], strides = [1, 1]} : vector<32x2xf32> to vector<1x1xf32>
    %385 = vector.broadcast %384 : vector<1x1xf32> to vector<16x128xf32>
    %386 = arith.mulf %385, %5 : vector<16x128xf32>
    %387 = vector.extract_strided_slice %0 {offsets = [25, 1], sizes = [1, 1], strides = [1, 1]} : vector<32x2xf32> to vector<1x1xf32>
    %388 = vector.broadcast %387 : vector<1x1xf32> to vector<16x128xf32>
    %389 = arith.mulf %388, %7 : vector<16x128xf32>
    %390 = arith.addf %386, %389 : vector<16x128xf32>
    %391 = vector.extract_strided_slice %1 {offsets = [25, 0], sizes = [1, 1], strides = [1, 1]} : vector<32x1xf32> to vector<1x1xf32>
    %392 = vector.broadcast %391 : vector<1x1xf32> to vector<16x128xf32>
    %393 = arith.addf %390, %392 : vector<16x128xf32>
    %394 = math.tanh %393 : vector<16x128xf32>
    %395 = vector.extract_strided_slice %2 {offsets = [25, 0], sizes = [1, 1], strides = [1, 1]} : vector<32x1xf32> to vector<1x1xf32>
    %396 = vector.broadcast %395 : vector<1x1xf32> to vector<16x128xf32>
    %397 = arith.mulf %396, %394 : vector<16x128xf32>
    %398 = arith.addf %383, %397 : vector<16x128xf32>
    %399 = vector.extract_strided_slice %0 {offsets = [26, 0], sizes = [1, 1], strides = [1, 1]} : vector<32x2xf32> to vector<1x1xf32>
    %400 = vector.broadcast %399 : vector<1x1xf32> to vector<16x128xf32>
    %401 = arith.mulf %400, %5 : vector<16x128xf32>
    %402 = vector.extract_strided_slice %0 {offsets = [26, 1], sizes = [1, 1], strides = [1, 1]} : vector<32x2xf32> to vector<1x1xf32>
    %403 = vector.broadcast %402 : vector<1x1xf32> to vector<16x128xf32>
    %404 = arith.mulf %403, %7 : vector<16x128xf32>
    %405 = arith.addf %401, %404 : vector<16x128xf32>
    %406 = vector.extract_strided_slice %1 {offsets = [26, 0], sizes = [1, 1], strides = [1, 1]} : vector<32x1xf32> to vector<1x1xf32>
    %407 = vector.broadcast %406 : vector<1x1xf32> to vector<16x128xf32>
    %408 = arith.addf %405, %407 : vector<16x128xf32>
    %409 = math.tanh %408 : vector<16x128xf32>
    %410 = vector.extract_strided_slice %2 {offsets = [26, 0], sizes = [1, 1], strides = [1, 1]} : vector<32x1xf32> to vector<1x1xf32>
    %411 = vector.broadcast %410 : vector<1x1xf32> to vector<16x128xf32>
    %412 = arith.mulf %411, %409 : vector<16x128xf32>
    %413 = arith.addf %398, %412 : vector<16x128xf32>
    %414 = vector.extract_strided_slice %0 {offsets = [27, 0], sizes = [1, 1], strides = [1, 1]} : vector<32x2xf32> to vector<1x1xf32>
    %415 = vector.broadcast %414 : vector<1x1xf32> to vector<16x128xf32>
    %416 = arith.mulf %415, %5 : vector<16x128xf32>
    %417 = vector.extract_strided_slice %0 {offsets = [27, 1], sizes = [1, 1], strides = [1, 1]} : vector<32x2xf32> to vector<1x1xf32>
    %418 = vector.broadcast %417 : vector<1x1xf32> to vector<16x128xf32>
    %419 = arith.mulf %418, %7 : vector<16x128xf32>
    %420 = arith.addf %416, %419 : vector<16x128xf32>
    %421 = vector.extract_strided_slice %1 {offsets = [27, 0], sizes = [1, 1], strides = [1, 1]} : vector<32x1xf32> to vector<1x1xf32>
    %422 = vector.broadcast %421 : vector<1x1xf32> to vector<16x128xf32>
    %423 = arith.addf %420, %422 : vector<16x128xf32>
    %424 = math.tanh %423 : vector<16x128xf32>
    %425 = vector.extract_strided_slice %2 {offsets = [27, 0], sizes = [1, 1], strides = [1, 1]} : vector<32x1xf32> to vector<1x1xf32>
    %426 = vector.broadcast %425 : vector<1x1xf32> to vector<16x128xf32>
    %427 = arith.mulf %426, %424 : vector<16x128xf32>
    %428 = arith.addf %413, %427 : vector<16x128xf32>
    %429 = vector.extract_strided_slice %0 {offsets = [28, 0], sizes = [1, 1], strides = [1, 1]} : vector<32x2xf32> to vector<1x1xf32>
    %430 = vector.broadcast %429 : vector<1x1xf32> to vector<16x128xf32>
    %431 = arith.mulf %430, %5 : vector<16x128xf32>
    %432 = vector.extract_strided_slice %0 {offsets = [28, 1], sizes = [1, 1], strides = [1, 1]} : vector<32x2xf32> to vector<1x1xf32>
    %433 = vector.broadcast %432 : vector<1x1xf32> to vector<16x128xf32>
    %434 = arith.mulf %433, %7 : vector<16x128xf32>
    %435 = arith.addf %431, %434 : vector<16x128xf32>
    %436 = vector.extract_strided_slice %1 {offsets = [28, 0], sizes = [1, 1], strides = [1, 1]} : vector<32x1xf32> to vector<1x1xf32>
    %437 = vector.broadcast %436 : vector<1x1xf32> to vector<16x128xf32>
    %438 = arith.addf %435, %437 : vector<16x128xf32>
    %439 = math.tanh %438 : vector<16x128xf32>
    %440 = vector.extract_strided_slice %2 {offsets = [28, 0], sizes = [1, 1], strides = [1, 1]} : vector<32x1xf32> to vector<1x1xf32>
    %441 = vector.broadcast %440 : vector<1x1xf32> to vector<16x128xf32>
    %442 = arith.mulf %441, %439 : vector<16x128xf32>
    %443 = arith.addf %428, %442 : vector<16x128xf32>
    %444 = vector.extract_strided_slice %0 {offsets = [29, 0], sizes = [1, 1], strides = [1, 1]} : vector<32x2xf32> to vector<1x1xf32>
    %445 = vector.broadcast %444 : vector<1x1xf32> to vector<16x128xf32>
    %446 = arith.mulf %445, %5 : vector<16x128xf32>
    %447 = vector.extract_strided_slice %0 {offsets = [29, 1], sizes = [1, 1], strides = [1, 1]} : vector<32x2xf32> to vector<1x1xf32>
    %448 = vector.broadcast %447 : vector<1x1xf32> to vector<16x128xf32>
    %449 = arith.mulf %448, %7 : vector<16x128xf32>
    %450 = arith.addf %446, %449 : vector<16x128xf32>
    %451 = vector.extract_strided_slice %1 {offsets = [29, 0], sizes = [1, 1], strides = [1, 1]} : vector<32x1xf32> to vector<1x1xf32>
    %452 = vector.broadcast %451 : vector<1x1xf32> to vector<16x128xf32>
    %453 = arith.addf %450, %452 : vector<16x128xf32>
    %454 = math.tanh %453 : vector<16x128xf32>
    %455 = vector.extract_strided_slice %2 {offsets = [29, 0], sizes = [1, 1], strides = [1, 1]} : vector<32x1xf32> to vector<1x1xf32>
    %456 = vector.broadcast %455 : vector<1x1xf32> to vector<16x128xf32>
    %457 = arith.mulf %456, %454 : vector<16x128xf32>
    %458 = arith.addf %443, %457 : vector<16x128xf32>
    %459 = vector.extract_strided_slice %0 {offsets = [30, 0], sizes = [1, 1], strides = [1, 1]} : vector<32x2xf32> to vector<1x1xf32>
    %460 = vector.broadcast %459 : vector<1x1xf32> to vector<16x128xf32>
    %461 = arith.mulf %460, %5 : vector<16x128xf32>
    %462 = vector.extract_strided_slice %0 {offsets = [30, 1], sizes = [1, 1], strides = [1, 1]} : vector<32x2xf32> to vector<1x1xf32>
    %463 = vector.broadcast %462 : vector<1x1xf32> to vector<16x128xf32>
    %464 = arith.mulf %463, %7 : vector<16x128xf32>
    %465 = arith.addf %461, %464 : vector<16x128xf32>
    %466 = vector.extract_strided_slice %1 {offsets = [30, 0], sizes = [1, 1], strides = [1, 1]} : vector<32x1xf32> to vector<1x1xf32>
    %467 = vector.broadcast %466 : vector<1x1xf32> to vector<16x128xf32>
    %468 = arith.addf %465, %467 : vector<16x128xf32>
    %469 = math.tanh %468 : vector<16x128xf32>
    %470 = vector.extract_strided_slice %2 {offsets = [30, 0], sizes = [1, 1], strides = [1, 1]} : vector<32x1xf32> to vector<1x1xf32>
    %471 = vector.broadcast %470 : vector<1x1xf32> to vector<16x128xf32>
    %472 = arith.mulf %471, %469 : vector<16x128xf32>
    %473 = arith.addf %458, %472 : vector<16x128xf32>
    %474 = vector.extract_strided_slice %0 {offsets = [31, 0], sizes = [1, 1], strides = [1, 1]} : vector<32x2xf32> to vector<1x1xf32>
    %475 = vector.broadcast %474 : vector<1x1xf32> to vector<16x128xf32>
    %476 = arith.mulf %475, %5 : vector<16x128xf32>
    %477 = vector.extract_strided_slice %0 {offsets = [31, 1], sizes = [1, 1], strides = [1, 1]} : vector<32x2xf32> to vector<1x1xf32>
    %478 = vector.broadcast %477 : vector<1x1xf32> to vector<16x128xf32>
    %479 = arith.mulf %478, %7 : vector<16x128xf32>
    %480 = arith.addf %476, %479 : vector<16x128xf32>
    %481 = vector.extract_strided_slice %1 {offsets = [31, 0], sizes = [1, 1], strides = [1, 1]} : vector<32x1xf32> to vector<1x1xf32>
    %482 = vector.broadcast %481 : vector<1x1xf32> to vector<16x128xf32>
    %483 = arith.addf %480, %482 : vector<16x128xf32>
    %484 = math.tanh %483 : vector<16x128xf32>
    %485 = vector.extract_strided_slice %2 {offsets = [31, 0], sizes = [1, 1], strides = [1, 1]} : vector<32x1xf32> to vector<1x1xf32>
    %486 = vector.broadcast %485 : vector<1x1xf32> to vector<16x128xf32>
    %487 = arith.mulf %486, %484 : vector<16x128xf32>
    %488 = arith.addf %473, %487 : vector<16x128xf32>
    %489 = vector.broadcast %3 : vector<1x1xf32> to vector<16x128xf32>
    %490 = arith.addf %488, %489 : vector<16x128xf32>
    %491 = arith.negf %490 : vector<16x128xf32>
    %492 = math.exp %491 : vector<16x128xf32>
    %cst_12 = arith.constant 1.000000e+00 : f32
    %493 = vector.broadcast %cst_12 : f32 to vector<16x128xf32>
    %494 = arith.addf %493, %492 : vector<16x128xf32>
    %495 = arith.divf %493, %494 : vector<16x128xf32>
    %c0_13 = arith.constant 0 : index
    %c0_14 = arith.constant 0 : index
    %496 = vector.load %arg6[%c0_13, %c0_14] : memref<16x128xf32, #tpu.memory_space<vmem>>, vector<16x128xf32>
    tpu.vector_store %arg6[%c0_13, %c0_14], %495 {strides = array<i32>} : memref<16x128xf32, #tpu.memory_space<vmem>>, vector<16x128xf32>,
    return
  }
  func.func @transform_0(%arg0: i32) -> (i32, i32, i32) {
    %c0_i32 = arith.constant 0 : i32
    %c0_i32_0 = arith.constant 0 : i32
    %c0_i32_1 = arith.constant 0 : i32
    return %c0_i32, %c0_i32_0, %arg0 : i32, i32, i32
  }
  func.func @transform_1(%arg0: i32) -> (i32, i32) {
    %c0_i32 = arith.constant 0 : i32
    %c0_i32_0 = arith.constant 0 : i32
    %c0_i32_1 = arith.constant 0 : i32
    return %c0_i32, %c0_i32_0 : i32, i32
  }
  func.func @transform_2(%arg0: i32) -> (i32, i32) {
    %c0_i32 = arith.constant 0 : i32
    %c0_i32_0 = arith.constant 0 : i32
    %c0_i32_1 = arith.constant 0 : i32
    return %c0_i32, %c0_i32_0 : i32, i32
  }
  func.func @transform_3(%arg0: i32) -> (i32, i32) {
    %c0_i32 = arith.constant 0 : i32
    %c0_i32_0 = arith.constant 0 : i32
    %c0_i32_1 = arith.constant 0 : i32
    return %c0_i32, %c0_i32_0 : i32, i32
  }
  func.func @transform_4(%arg0: i32) -> (i32, i32) {
    %c0_i32 = arith.constant 0 : i32
    %c0_i32_0 = arith.constant 0 : i32
    %c0_i32_1 = arith.constant 0 : i32
    return %c0_i32, %c0_i32_0 : i32, i32
  }
  func.func @transform_5(%arg0: i32) -> (i32, i32) {
    %c0_i32 = arith.constant 0 : i32
    %c0_i32_0 = arith.constant 0 : i32
    return %c0_i32, %arg0 : i32, i32
  }
}

</mosaic_0001>

<bundles_post_ra>
// kernel: policy_forward.1
= control target key start
LH: loop header
LB: loop body
LE: loop exit
PB: predicated region body
PF: predicated region fallthrough
CT: control target
= control target key end

     0   :  { %s1465_s20 = smov 127   ;;  %v1466_v10 = vmov 0   ;;  %s2366_s1 = inlined_call_operand.vmem [shape: f32[32,2], index: 1, kind: input, shape index: {}]   ;;  %s2367_s4 = inlined_call_operand.<no memory space> [shape: f32[1,1], index: 4, kind: input, shape index: {}]   ;;  %s2368_s2 = inlined_call_operand.vmem [shape: f32[32,1], index: 2, kind: input, shape index: {}]   ;;  %s2369_s3 = inlined_call_operand.vmem [shape: f32[32,1], index: 3, kind: input, shape index: {}]   ;;  %s2370_s0 = inlined_call_operand.vmem [shape: f32[2,16,128], index: 0, kind: input, shape index: {}]   ;;  %s2371_s5 = inlined_call_operand.vmem [shape: f32[16,128], index: 5, kind: output, shape index: {}]  }
   0x1   :  { %v1500_v0 = vld [vmem:[%s2366_s1] sm:$0xff]  ;;  %v10_v7 = vstv %s2367_s4  ;;  %v1533_v9 = vld [vmem:[%s2366_s1 + $0x8] sm:$0xff]  ;;  %1324 = vset.pattern.permute.xlu0 %v1466_v10  ;;  %v1568_v18 = vld [vmem:[%s2366_s1 + $0x10] sm:$0xff] }
   0x2   :  { %46 = vrot.lane.b32.xlu0 %v1500_v0, %s1465_s20  ;;  %v102_v1 = vrot.slane %v1500_v0, 2  ;;  %v71_v2 = vrot.slane %v1500_v0, 1  ;;  %1066 = vpush %v1500_v0  ;;  %v133_v3 = vrot.slane %v1500_v0, 3  ;;  %v164_v4 = vrot.slane %v1500_v0, 4  ;;  %11 = vst [vmem:[#allocation2] sm:$0x1] %v10_v7 }
   0x3   :  { %v195_v5 = vrot.slane %v1500_v0, 5  ;;  %v226_v6 = vrot.slane %v1500_v0, 6  ;;  %v257_v8 = vrot.slane %v1500_v0, 7  ;;  %v319_v11 = vrot.slane %v1533_v9, 1  ;;  %v1603_v26 = vld [vmem:[%s2366_s1 + $0x18] sm:$0xff]  ;;  %v26_v35 = vld [vmem:[%s2368_s2] sm:$0xff] }
   0x4   :  { %108 = vrot.lane.b32.xlu1 %v102_v1, %s1465_s20  ;;  %v350_v12 = vrot.slane %v1533_v9, 2  ;;  %v381_v13 = vrot.slane %v1533_v9, 3  ;;  %v412_v14 = vrot.slane %v1533_v9, 4  ;;  %v443_v15 = vrot.slane %v1533_v9, 5  ;;  %v30_v37 = vld [vmem:[%s2369_s3] sm:$0xff]  ;;  %v1664_v60 = vld [vmem:[%s2368_s2 + $0x8] sm:$0xff] }
   0x5   :  { %v474_v16 = vrot.slane %v1533_v9, 6  ;;  %v505_v17 = vrot.slane %v1533_v9, 7  ;;  %v567_v19 = vrot.slane %v1568_v18, 1  ;;  %v598_v20 = vrot.slane %v1568_v18, 2  ;;  %v1670_v61 = vld [vmem:[%s2369_s3 + $0x8] sm:$0xff]  ;;  %v1692_v10 = vld [vmem:[%s2368_s2 + $0x10] sm:$0xff] }
   0x6   :  { %77 = vrot.lane.b32.xlu0 %v71_v2, %s1465_s20  ;;  %v629_v21 = vrot.slane %v1568_v18, 3  ;;  %v660_v22 = vrot.slane %v1568_v18, 4  ;;  %v691_v23 = vrot.slane %v1568_v18, 5  ;;  %v722_v24 = vrot.slane %v1568_v18, 6 }
   0x7   :  { %v753_v25 = vrot.slane %v1568_v18, 7  ;;  %v815_v27 = vrot.slane %v1603_v26, 1  ;;  %v846_v28 = vrot.slane %v1603_v26, 2  ;;  %v877_v29 = vrot.slane %v1603_v26, 3 }
   0x8   :  { %139 = vrot.lane.b32.xlu1 %v133_v3, %s1465_s20  ;;  %v908_v30 = vrot.slane %v1603_v26, 4  ;;  %v2374_v31 = vrot.slane %v1603_v26, 5  ;;  %v2373_v32 = vrot.slane %v1603_v26, 6  ;;  %v2372_v33 = vrot.slane %v1603_v26, 7 }
   0x9   :  { %v1063_v34 = vld [vmem:[#allocation2] ss:$0 sm:$0xff]  ;;  %v86_v38 = vrot.slane %v26_v35, 1  ;;  %v94_v39 = vrot.slane %v30_v37, 1  ;;  %v117_v42 = vrot.slane %v26_v35, 2  ;;  %v125_v43 = vrot.slane %v30_v37, 2 }
   0xa   :  { %170 = vrot.lane.b32.xlu0 %v164_v4, %s1465_s20  ;;  %v148_v45 = vrot.slane %v26_v35, 3  ;;  %v156_v46 = vrot.slane %v30_v37, 3  ;;  %v179_v48 = vrot.slane %v26_v35, 4  ;;  %v187_v49 = vrot.slane %v30_v37, 4 }
   0xb   :  { %v210_v51 = vrot.slane %v26_v35, 5  ;;  %v218_v52 = vrot.slane %v30_v37, 5  ;;  %v241_v54 = vrot.slane %v26_v35, 6  ;;  %v249_v55 = vrot.slane %v30_v37, 6 }
   0xc   :  { %201 = vrot.lane.b32.xlu1 %v195_v5, %s1465_s20  ;;  %v272_v57 = vrot.slane %v26_v35, 7  ;;  %v280_v58 = vrot.slane %v30_v37, 7  ;;  %v334_v63 = vrot.slane %v1664_v60, 1  ;;  %v342_v0 = vrot.slane %v1670_v61, 1 }
   0xe   :  { %232 = vrot.lane.b32.xlu0 %v226_v6, %s1465_s20 }
  0x10   :  { %263 = vrot.lane.b32.xlu1 %v257_v8, %s1465_s20 }
  0x12   :  { %294 = vrot.lane.b32.xlu0 %v1533_v9, %s1465_s20 }
  0x14   :  { %325 = vrot.lane.b32.xlu1 %v319_v11, %s1465_s20 }
  0x16   :  { %356 = vrot.lane.b32.xlu0 %v350_v12, %s1465_s20 }
  0x18   :  { %387 = vrot.lane.b32.xlu1 %v381_v13, %s1465_s20 }
  0x1a   :  { %418 = vrot.lane.b32.xlu0 %v412_v14, %s1465_s20 }
  0x1c   :  { %449 = vrot.lane.b32.xlu1 %v443_v15, %s1465_s20 }
  0x1e   :  { %480 = vrot.lane.b32.xlu0 %v474_v16, %s1465_s20 }
  0x20   :  { %511 = vrot.lane.b32.xlu1 %v505_v17, %s1465_s20 }
  0x22   :  { %542 = vrot.lane.b32.xlu0 %v1568_v18, %s1465_s20 }
  0x24   :  { %573 = vrot.lane.b32.xlu1 %v567_v19, %s1465_s20 }
  0x26   :  { %604 = vrot.lane.b32.xlu0 %v598_v20, %s1465_s20 }
  0x28   :  { %635 = vrot.lane.b32.xlu1 %v629_v21, %s1465_s20 }
  0x2a   :  { %666 = vrot.lane.b32.xlu0 %v660_v22, %s1465_s20 }
  0x2c   :  { %697 = vrot.lane.b32.xlu1 %v691_v23, %s1465_s20 }
  0x2e   :  { %728 = vrot.lane.b32.xlu0 %v722_v24, %s1465_s20 }
  0x30   :  { %759 = vrot.lane.b32.xlu1 %v753_v25, %s1465_s20 }
  0x32   :  { %790 = vrot.lane.b32.xlu0 %v1603_v26, %s1465_s20 }
  0x33   :  { %s1686_s10 = spop %1066 }
  0x34   :  { %821 = vrot.lane.b32.xlu1 %v815_v27, %s1465_s20 }
  0x36   :  { %852 = vrot.lane.b32.xlu0 %v846_v28, %s1465_s20 }
  0x38   :  { %883 = vrot.lane.b32.xlu1 %v877_v29, %s1465_s20 }
  0x3a   :  { %914 = vrot.lane.b32.xlu0 %v908_v30, %s1465_s20 }
  0x3c   :  { %945 = vrot.lane.b32.xlu1 %v2374_v31, %s1465_s20 }
  0x3e   :  { %976 = vrot.lane.b32.xlu0 %v2373_v32, %s1465_s20 }
  0x40   :  { %1007 = vrot.lane.b32.xlu1 %v2372_v33, %s1465_s20 }
  0x42   :  { %1038 = vperm.xlu0 %1324, %v1063_v34   ;;  %v466_v34 = vrot.slane %v1670_v61, 5 }
  0x74   :  { %v47_v36 = vpop.permute.xlu0 %46 }
  0x75   :  { %1068 = vpush %v47_v36  ;;  %v1710_v36 = vld [vmem:[%s2370_s0 + $0x8] sm:$0xff] }
  0x76   :  { %1070 = vpush %v26_v35  ;;  %v109_v40 = vpop.permute.xlu1 %108  ;;  %v1705_v35 = vld [vmem:[%s2370_s0] sm:$0xff] }
  0x77   :  { %1072 = vpush %v30_v37  ;;  %v42_v37 = vstv %s1686_s10 }
  0x78   :  { %v78_v41 = vpop.permute.xlu0 %77  ;;  %1074 = vpush %v71_v2  ;;  %v365_v2 = vrot.slane %v1664_v60, 2 }
  0x79   :  { %1076 = vpush %v78_v41  ;;  %v528_v41 = vrot.slane %v1670_v61, 7 }
  0x7a   :  { %1078 = vpush %v86_v38  ;;  %v140_v44 = vpop.permute.xlu1 %139  ;;  %v489_v38 = vrot.slane %v1664_v60, 6 }
  0x7b   :  { %1080 = vpush %v94_v39  ;;  %v497_v39 = vrot.slane %v1670_v61, 6 }
  0x7c   :  { %1082 = vpush %v102_v1  ;;  %v171_v47 = vpop.permute.xlu0 %170 }
  0x7d   :  { %1084 = vpush %v109_v40  ;;  %v520_v40 = vrot.slane %v1664_v60, 7 }
  0x7e   :  { %1086 = vpush %v117_v42  ;;  %v202_v50 = vpop.permute.xlu1 %201  ;;  %v582_v42 = vrot.slane %v1692_v10, 1 }
  0x7f   :  { %1088 = vpush %v125_v43 }
  0x80   :  { %1090 = vpush %v133_v3  ;;  %v233_v53 = vpop.permute.xlu0 %232  ;;  %v373_v3 = vrot.slane %v1670_v61, 2 }
  0x81   :  { %1092 = vpush %v140_v44  ;;  %v613_v44 = vrot.slane %v1692_v10, 2 }
  0x82   :  { %1094 = vpush %v148_v45  ;;  %v264_v56 = vpop.permute.xlu1 %263 }
  0x83   :  { %1096 = vpush %v156_v46  ;;  %v1731_v46 = vld [vmem:[%s2370_s0 + $0x18] sm:$0xff] }
  0x84   :  { %1098 = vpush %v164_v4  ;;  %v295_v59 = vpop.permute.xlu0 %294 }
  0x85   :  { %1100 = vpush %v171_v47 }
  0x86   :  { %1102 = vpush %v179_v48  ;;  %v326_v62 = vpop.permute.xlu1 %325  ;;  %v644_v48 = vrot.slane %v1692_v10, 3 }
  0x87   :  { %1104 = vpush %v187_v49 }
  0x88   :  { %1106 = vpush %v195_v5  ;;  %v357_v1 = vpop.permute.xlu0 %356  ;;  %v396_v5 = vrot.slane %v1664_v60, 3 }
  0x89   :  { %1108 = vpush %v202_v50  ;;  %v44_v50 = vmul.f32 %v42_v37, %v1705_v35 }
  0x8a   :  { %1110 = vpush %v210_v51  ;;  %v388_v4 = vpop.permute.xlu1 %387  ;;  %v45_v51 = vmul.f32 %v42_v37, %v1710_v36 }
  0x8b   :  { %1112 = vpush %v218_v52  ;;  %v675_v52 = vrot.slane %v1692_v10, 4 }
  0x8c   :  { %1114 = vpush %v226_v6  ;;  %v404_v6 = vrot.slane %v1670_v61, 3  ;;  %v419_v7 = vpop.permute.xlu0 %418 }
  0x8d   :  { %1116 = vpush %v233_v53 }
  0x8e   :  { %1118 = vpush %v241_v54  ;;  %v450_v47 = vpop.permute.xlu1 %449  ;;  %v706_v54 = vrot.slane %v1692_v10, 5 }
  0x8f   :  { %1120 = vpush %v249_v55 }
  0x90   :  { %1122 = vpush %v257_v8  ;;  %v427_v8 = vrot.slane %v1664_v60, 4 }
  0x91   :  { %1124 = vpush %v264_v56  ;;  %v1743_v56 = vld [vmem:[%s2368_s2 + $0x18] sm:$0xff] }
  0x92   :  { %1126 = vpush %v272_v57  ;;  %v512_v33 = vpop.permute.xlu1 %511 }
  0x93   :  { %1128 = vpush %v280_v58  ;;  %v737_v58 = vrot.slane %v1692_v10, 6 }
  0x94   :  { %1130 = vpush %v1533_v9 }
  0x95   :  { %1132 = vpush %v295_v59 }
  0x96   :  { %1134 = vpush %v1664_v60 }
  0x97   :  { %1136 = vpush %v1670_v61 }
  0x98   :  { %1138 = vpush %v319_v11  ;;  %v1697_v11 = vld [vmem:[%s2369_s3 + $0x10] sm:$0xff] }
  0x99   :  { %1140 = vpush %v326_v62  ;;  %v590_v43 = vrot.slane %v1697_v11, 1  ;;  %v621_v45 = vrot.slane %v1697_v11, 2  ;;  %v652_v49 = vrot.slane %v1697_v11, 3  ;;  %v683_v53 = vrot.slane %v1697_v11, 4 }
  0x9a   :  { %1142 = vpush %v334_v63  ;;  %v714_v57 = vrot.slane %v1697_v11, 5  ;;  %v1756_v63 = vld [vmem:[%s2369_s3 + $0x18] sm:$0xff] }
  0x9b   :  { %1144 = vpush %v342_v0  ;;  %v745_v0 = vrot.slane %v1697_v11, 6 }
  0x9c   :  { %1146 = vpush %v350_v12  ;;  %v435_v12 = vrot.slane %v1670_v61, 4 }
  0x9d   :  { %1148 = vpush %v357_v1  ;;  %v776_v1 = vrot.slane %v1697_v11, 7 }
  0x9e   :  { %1150 = vpush %v365_v2 }
  0x9f   :  { %1152 = vpush %v373_v3  ;;  %v481_v3 = vpop.permute.xlu0 %480 }
  0xa0   :  { %1154 = vpush %v381_v13  ;;  %v458_v13 = vrot.slane %v1664_v60, 5 }
  0xa1   :  { %1156 = vpush %v388_v4  ;;  %v830_v4 = vrot.slane %v1743_v56, 1 }
  0xa2   :  { %1158 = vpush %v396_v5 }
  0xa3   :  { %1160 = vpush %v404_v6 }
  0xa4   :  { %1162 = vpush %v412_v14  ;;  %v1726_v14 = vld [vmem:[%s2370_s0 + $0x10] sm:$0xff] }
  0xa5   :  { %1164 = vpush %v419_v7 }
  0xa6   :  { %1166 = vpush %v427_v8  ;;  %s1069_s23 = spop %1068  ;;  %v838_v8 = vrot.slane %v1756_v63, 1 }
  0xa7   :  { %1168 = vpush %v435_v12  ;;  %v49_v55 = vstv %s1069_s23  ;;  %s1745_s25 = spop %1070 }
  0xa8   :  { %1170 = vpush %v443_v15  ;;  %v51_v59 = vmul.f32 %v1726_v14, %v49_v55  ;;  %v52_v62 = vmul.f32 %v1731_v46, %v49_v55  ;;  %s1758_s2 = spop %1072  ;;  %v768_v15 = vrot.slane %v1692_v10, 7  ;;  %v57_v2 = vstv %s1745_s25 }
  0xa9   :  { %1172 = vpush %v450_v47  ;;  %s1075_s1 = spop %1074 }
  0xaa   :  { %1174 = vpush %v458_v13  ;;  %v53_v5 = vadd.f32 %v51_v59, %v44_v50  ;;  %v54_v6 = vadd.f32 %v52_v62, %v45_v51  ;;  %v73_v7 = vstv %s1075_s1  ;;  %s1077_s3 = spop %1076  ;;  %v869_v59 = vrot.slane %v1756_v63, 2 }
  0xab   :  { %1176 = vpush %v466_v34  ;;  %v75_v12 = vmul.f32 %v73_v7, %v1705_v35  ;;  %v76_v37 = vmul.f32 %v73_v7, %v1710_v36  ;;  %v80_v47 = vstv %s1077_s3  ;;  %s1079_s28 = spop %1078  ;;  %v861_v34 = vrot.slane %v1743_v56, 2 }
  0xac   :  { %1178 = vpush %v474_v16  ;;  %v59_v55 = vadd.f32 %v57_v2, %v53_v5  ;;  %v82_v13 = vmul.f32 %v1726_v14, %v80_v47  ;;  %v83_v50 = vmul.f32 %v1731_v46, %v80_v47  ;;  %s1772_s29 = spop %1080  ;;  %v60_v51 = vadd.f32 %v57_v2, %v54_v6 }
  0xad   :  { %1180 = vpush %v481_v3  ;;  %s1083_s30 = spop %1082  ;;  %v892_v62 = vrot.slane %v1743_v56, 3  ;;  %v900_v7 = vrot.slane %v1756_v63, 3  ;;  %v88_v47 = vstv %s1079_s28 }
  0xae   :  { %1182 = vpush %v489_v38  ;;  %v84_v16 = vadd.f32 %v82_v13, %v75_v12  ;;  %v85_v5 = vadd.f32 %v83_v50, %v76_v37  ;;  %v104_v32 = vstv %s1083_s30  ;;  %s1085_s6 = spop %1084  ;;  %1325 = vtanh.f32 %v59_v55  ;;  %v543_v13 = vpop.permute.xlu0 %542 }
  0xaf   :  { %1184 = vpush %v497_v39  ;;  %v106_v2 = vmul.f32 %v104_v32, %v1705_v35  ;;  %v107_v3 = vmul.f32 %v104_v32, %v1710_v36  ;;  %v111_v6 = vstv %s1085_s6  ;;  %s1087_s7 = spop %1086  ;;  %1327 = vtanh.f32 %v60_v51 }
  0xb0   :  { %1186 = vpush %v505_v17  ;;  %v90_v31 = vadd.f32 %v88_v47, %v84_v16  ;;  %v91_v38 = vadd.f32 %v88_v47, %v85_v5  ;;  %v113_v12 = vmul.f32 %v1726_v14, %v111_v6  ;;  %v114_v37 = vmul.f32 %v1731_v46, %v111_v6  ;;  %s1788_s8 = spop %1088 }
  0xb1   :  { %1188 = vpush %v512_v33  ;;  %v119_v39 = vstv %s1087_s7  ;;  %s1091_s9 = spop %1090  ;;  %v923_v55 = vrot.slane %v1743_v56, 4  ;;  %v931_v32 = vrot.slane %v1756_v63, 4  ;;  %v962_v47 = vrot.slane %v1756_v63, 5 }
  0xb2   :  { %1190 = vpush %v520_v40  ;;  %1329 = vtanh.f32 %v90_v31  ;;  %v115_v9 = vadd.f32 %v113_v12, %v106_v2  ;;  %v116_v17 = vadd.f32 %v114_v37, %v107_v3  ;;  %v135_v50 = vstv %s1091_s9  ;;  %s1093_s10 = spop %1092  ;;  %v574_v3 = vpop.permute.xlu1 %573 }
  0xb3   :  { %1192 = vpush %v528_v41  ;;  %1331 = vtanh.f32 %v91_v38  ;;  %v137_v33 = vmul.f32 %v135_v50, %v1705_v35  ;;  %v138_v51 = vmul.f32 %v135_v50, %v1710_v36  ;;  %v142_v16 = vstv %s1093_s10  ;;  %s1095_s11 = spop %1094 }
  0xb4   :  { %1194 = vpush %v1568_v18  ;;  %v121_v5 = vadd.f32 %v119_v39, %v115_v9  ;;  %v122_v60 = vadd.f32 %v119_v39, %v116_v17  ;;  %v144_v31 = vmul.f32 %v1726_v14, %v142_v16  ;;  %v145_v40 = vmul.f32 %v1731_v46, %v142_v16  ;;  %s1801_s12 = spop %1096 }
  0xb5   :  { %1196 = vpush %v543_v13  ;;  %v150_v61 = vstv %s1095_s11  ;;  %s1099_s13 = spop %1098  ;;  %v954_v41 = vrot.slane %v1743_v56, 5  ;;  %v985_v2 = vrot.slane %v1743_v56, 6 }
  0xb6   :  { %1198 = vpush %v1692_v10  ;;  %1333 = vtanh.f32 %v121_v5  ;;  %v146_v6 = vadd.f32 %v144_v31, %v137_v33  ;;  %v147_v38 = vadd.f32 %v145_v40, %v138_v51  ;;  %v166_v12 = vstv %s1099_s13  ;;  %s1101_s14 = spop %1100  ;;  %v605_v31 = vpop.permute.xlu0 %604 }
  0xb7   :  { %1200 = vpush %v1697_v11  ;;  %1335 = vtanh.f32 %v122_v60  ;;  %v168_v37 = vmul.f32 %v166_v12, %v1705_v35  ;;  %v169_v39 = vmul.f32 %v166_v12, %v1710_v36  ;;  %v173_v13 = vstv %s1101_s14  ;;  %s1103_s15 = spop %1102 }
  0xb8   :  { %1202 = vpush %v567_v19  ;;  %v152_v9 = vadd.f32 %v150_v61, %v146_v6  ;;  %v153_v17 = vadd.f32 %v150_v61, %v147_v38  ;;  %v175_v50 = vmul.f32 %v1726_v14, %v173_v13  ;;  %v176_v33 = vmul.f32 %v1731_v46, %v173_v13  ;;  %s1814_s16 = spop %1104 }
  0xb9   :  { %1204 = vpush %v574_v3  ;;  %v181_v51 = vstv %s1103_s15  ;;  %s1107_s17 = spop %1106  ;;  %v65_v12 = vstv %s1758_s2 }
  0xba   :  { %1206 = vpush %v582_v42  ;;  %1337 = vtanh.f32 %v152_v9  ;;  %v177_v19 = vadd.f32 %v175_v50, %v168_v37  ;;  %v178_v40 = vadd.f32 %v176_v33, %v169_v39  ;;  %v197_v61 = vstv %s1107_s17  ;;  %s1109_s18 = spop %1108 }
  0xbb   :  { %1208 = vpush %v590_v43  ;;  %1339 = vtanh.f32 %v153_v17  ;;  %v199_v3 = vmul.f32 %v197_v61, %v1705_v35  ;;  %v200_v6 = vmul.f32 %v197_v61, %v1710_v36  ;;  %v204_v38 = vstv %s1109_s18  ;;  %s1825_s19 = spop %1110  ;;  %v1326_v42 = vpop.eup %1325  ;;  %v636_v61 = vpop.permute.xlu1 %635 }
  0xbc   :  { %1210 = vpush %v598_v20  ;;  %v183_v37 = vadd.f32 %v181_v51, %v177_v19  ;;  %v184_v39 = vadd.f32 %v181_v51, %v178_v40  ;;  %v206_v13 = vmul.f32 %v1726_v14, %v204_v38  ;;  %s1831_s20 = spop %1112  ;;  %v96_v43 = vstv %s1772_s29  ;;  %v1328_v33 = vpop.eup %1327 }
  0xbd   :  { %1212 = vpush %v605_v31  ;;  %v127_v9 = vstv %s1788_s8  ;;  %v207_v17 = vmul.f32 %v1731_v46, %v204_v38  ;;  %v212_v50 = vstv %s1825_s19  ;;  %s1115_s21 = spop %1114  ;;  %v158_v20 = vstv %s1801_s12 }
  0xbe   :  { %1214 = vpush %v613_v44  ;;  %1341 = vtanh.f32 %v183_v37  ;;  %v208_v51 = vadd.f32 %v206_v13, %v199_v3  ;;  %v228_v19 = vstv %s1115_s21  ;;  %s1117_s22 = spop %1116  ;;  %v189_v3 = vstv %s1814_s16 }
  0xbf   :  { %v1330_v40 = vpop.eup %1329  ;;  %1216 = vpush %v621_v45  ;;  %1343 = vtanh.f32 %v184_v39  ;;  %v209_v31 = vadd.f32 %v207_v17, %v200_v6  ;;  %v230_v38 = vmul.f32 %v228_v19, %v1705_v35  ;;  %v231_v60 = vmul.f32 %v228_v19, %v1710_v36  ;;  %s1844_s23 = spop %1118  ;;  %v667_v19 = vpop.permute.xlu0 %666 }
  0xc0   :  { %v1332_v5 = vpop.eup %1331  ;;  %1218 = vpush %v629_v21  ;;  %v98_v44 = vmul.f32 %v1330_v40, %v96_v43  ;;  %v214_v37 = vadd.f32 %v212_v50, %v208_v51  ;;  %v235_v13 = vstv %s1117_s22  ;;  %s1849_s24 = spop %1120  ;;  %v67_v21 = vmul.f32 %v1326_v42, %v65_v12 }
  0xc1   :  { %1220 = vpush %v636_v61  ;;  %v99_v45 = vmul.f32 %v1332_v5, %v96_v43  ;;  %v215_v6 = vadd.f32 %v212_v50, %v209_v31  ;;  %v237_v39 = vmul.f32 %v1726_v14, %v235_v13  ;;  %v238_v17 = vmul.f32 %v1731_v46, %v235_v13  ;;  %s1123_s4 = spop %1122 }
  0xc2   :  { %1222 = vpush %v644_v48  ;;  %1345 = vtanh.f32 %v214_v37  ;;  %v243_v40 = vstv %s1844_s23  ;;  %v259_v16 = vstv %s1123_s4  ;;  %s1125_s25 = spop %1124  ;;  %v68_v5 = vmul.f32 %v1328_v33, %v65_v12 }
  0xc3   :  { %v1334_v51 = vpop.eup %1333  ;;  %1224 = vpush %v652_v49  ;;  %1347 = vtanh.f32 %v215_v6  ;;  %v239_v43 = vadd.f32 %v237_v39, %v230_v38  ;;  %v240_v50 = vadd.f32 %v238_v17, %v231_v60  ;;  %s1858_s26 = spop %1126  ;;  %v100_v48 = vadd.f32 %v98_v44, %v67_v21  ;;  %v698_v38 = vpop.permute.xlu1 %697 }
  0xc4   :  { %v1336_v61 = vpop.eup %1335  ;;  %1226 = vpush %v660_v22  ;;  %v261_v42 = vmul.f32 %v259_v16, %v1705_v35  ;;  %v262_v31 = vmul.f32 %v259_v16, %v1710_v36  ;;  %v266_v37 = vstv %s1125_s25  ;;  %s1864_s27 = spop %1128  ;;  %v101_v49 = vadd.f32 %v99_v45, %v68_v5 }
  0xc5   :  { %1228 = vpush %v667_v19  ;;  %v245_v60 = vadd.f32 %v243_v40, %v239_v43  ;;  %v246_v12 = vadd.f32 %v243_v40, %v240_v50  ;;  %v268_v33 = vmul.f32 %v1726_v14, %v266_v37  ;;  %s1131_s2 = spop %1130  ;;  %v129_v22 = vmul.f32 %v1334_v51, %v127_v9  ;;  %v729_v43 = vpop.permute.xlu0 %728 }
  0xc6   :  { %1230 = vpush %v675_v52  ;;  %v220_v44 = vstv %s1831_s20  ;;  %v269_v16 = vmul.f32 %v1731_v46, %v266_v37  ;;  %v274_v13 = vstv %s1858_s26  ;;  %s1133_s1 = spop %1132  ;;  %v130_v45 = vmul.f32 %v1336_v61, %v127_v9 }
  0xc7   :  { %v1338_v6 = vpop.eup %1337  ;;  %1232 = vpush %v683_v53  ;;  %1349 = vtanh.f32 %v245_v60  ;;  %v270_v39 = vadd.f32 %v268_v33, %v261_v42  ;;  %v290_v17 = vstv %s1131_s2  ;;  %s1878_s3 = spop %1134  ;;  %v131_v19 = vadd.f32 %v129_v22, %v100_v48 }
  0xc8   :  { %v1340_v52 = vpop.eup %1339  ;;  %1234 = vpush %v691_v23  ;;  %1351 = vtanh.f32 %v246_v12  ;;  %v271_v21 = vadd.f32 %v269_v16, %v262_v31  ;;  %v292_v40 = vmul.f32 %v290_v17, %v1705_v35  ;;  %s1883_s28 = spop %1136  ;;  %v132_v53 = vadd.f32 %v130_v45, %v101_v49  ;;  %v760_v16 = vpop.permute.xlu1 %759 }
  0xc9   :  { %1236 = vpush %v698_v38  ;;  %v276_v9 = vadd.f32 %v274_v13, %v270_v39  ;;  %v293_v51 = vmul.f32 %v290_v17, %v1710_v36  ;;  %v297_v5 = vstv %s1133_s1  ;;  %s1886_s29 = spop %1138  ;;  %v160_v23 = vmul.f32 %v1338_v6, %v158_v20 }
  0xca   :  { %1238 = vpush %v706_v54  ;;  %v277_v50 = vadd.f32 %v274_v13, %v271_v21  ;;  %v299_v61 = vmul.f32 %v1726_v14, %v297_v5  ;;  %v300_v48 = vmul.f32 %v1731_v46, %v297_v5  ;;  %s1894_s30 = spop %1140  ;;  %v161_v31 = vmul.f32 %v1340_v52, %v158_v20  ;;  %v791_v5 = vpop.permute.xlu0 %790 }
  0xcb   :  { %v1342_v42 = vpop.eup %1341  ;;  %1240 = vpush %v714_v57  ;;  %v251_v37 = vstv %s1849_s24  ;;  %1353 = vtanh.f32 %v276_v9  ;;  %v305_v54 = vstv %s1878_s3  ;;  %s1902_s6 = spop %1142  ;;  %v162_v60 = vadd.f32 %v160_v23, %v131_v19 }
  0xcc   :  { %v1344_v49 = vpop.eup %1343  ;;  %1242 = vpush %v722_v24  ;;  %1355 = vtanh.f32 %v277_v50  ;;  %v301_v12 = vadd.f32 %v299_v61, %v292_v40  ;;  %v302_v33 = vadd.f32 %v300_v48, %v293_v51  ;;  %s1906_s7 = spop %1144  ;;  %v163_v57 = vadd.f32 %v161_v31, %v132_v53 }
  0xcd   :  { %1244 = vpush %v729_v43  ;;  %v282_v20 = vstv %s1864_s27  ;;  %v321_v38 = vstv %s1886_s29  ;;  %v328_v22 = vstv %s1894_s30  ;;  %s1911_s8 = spop %1146  ;;  %v191_v24 = vmul.f32 %v1342_v42, %v189_v3 }
  0xce   :  { %1246 = vpush %v737_v58  ;;  %v307_v13 = vadd.f32 %v305_v54, %v301_v12  ;;  %v308_v6 = vadd.f32 %v305_v54, %v302_v33  ;;  %v323_v45 = vmul.f32 %v321_v38, %v1705_v35  ;;  %s1918_s9 = spop %1148  ;;  %v192_v17 = vmul.f32 %v1344_v49, %v189_v3  ;;  %v822_v12 = vpop.permute.xlu1 %821 }
  0xcf   :  { %v1346_v39 = vpop.eup %1345  ;;  %1248 = vpush %v745_v0  ;;  %v324_v52 = vmul.f32 %v321_v38, %v1710_v36  ;;  %v330_v58 = vmul.f32 %v1726_v14, %v328_v22  ;;  %v331_v19 = vmul.f32 %v1731_v46, %v328_v22  ;;  %s1927_s10 = spop %1150  ;;  %v193_v40 = vadd.f32 %v191_v24, %v162_v60 }
  0xd0   :  { %v1348_v21 = vpop.eup %1347  ;;  %1250 = vpush %v753_v25  ;;  %1357 = vtanh.f32 %v307_v13  ;;  %v336_v53 = vstv %s1902_s6  ;;  %v352_v0 = vstv %s1911_s8  ;;  %s1933_s11 = spop %1152  ;;  %v194_v3 = vadd.f32 %v192_v17, %v163_v57 }
  0xd1   :  { %1252 = vpush %v760_v16  ;;  %1359 = vtanh.f32 %v308_v6  ;;  %v332_v9 = vadd.f32 %v330_v58, %v323_v45  ;;  %v333_v51 = vadd.f32 %v331_v19, %v324_v52  ;;  %s1935_s12 = spop %1154  ;;  %v222_v18 = vmul.f32 %v1346_v39, %v220_v44 }
  0xd2   :  { %1254 = vpush %v768_v15  ;;  %v354_v25 = vmul.f32 %v352_v0, %v1705_v35  ;;  %v355_v43 = vmul.f32 %v352_v0, %v1710_v36  ;;  %v359_v23 = vstv %s1918_s9  ;;  %s1944_s13 = spop %1156  ;;  %v223_v50 = vmul.f32 %v1348_v21, %v220_v44 }
  0xd3   :  { %1256 = vpush %v776_v1  ;;  %v338_v61 = vadd.f32 %v336_v53, %v332_v9  ;;  %v339_v48 = vadd.f32 %v336_v53, %v333_v51  ;;  %v361_v10 = vmul.f32 %v1726_v14, %v359_v23  ;;  %s1951_s14 = spop %1158  ;;  %v313_v42 = vstv %s1883_s28 }
  0xd4   :  { %v1350_v15 = vpop.eup %1349  ;;  %1258 = vpush %v1603_v26  ;;  %v362_v31 = vmul.f32 %v1731_v46, %v359_v23  ;;  %v367_v54 = vstv %s1927_s10  ;;  %v383_v49 = vstv %s1935_s12  ;;  %s1958_s15 = spop %1160  ;;  %v224_v1 = vadd.f32 %v222_v18, %v193_v40 }
  0xd5   :  { %v1352_v11 = vpop.eup %1351  ;;  %1260 = vpush %v791_v5  ;;  %v225_v44 = vadd.f32 %v223_v50, %v194_v3  ;;  %1361 = vtanh.f32 %v338_v61  ;;  %v363_v60 = vadd.f32 %v361_v10, %v354_v25  ;;  %s1960_s16 = spop %1162  ;;  %v385_v57 = vmul.f32 %v383_v49, %v1705_v35 }
  0xd6   :  { %1262 = vpush %v1743_v56  ;;  %1363 = vtanh.f32 %v339_v48  ;;  %v364_v33 = vadd.f32 %v362_v31, %v355_v43  ;;  %v386_v38 = vmul.f32 %v383_v49, %v1710_v36  ;;  %s1965_s17 = spop %1164  ;;  %v253_v22 = vmul.f32 %v1350_v15, %v251_v37 }
  0xd7   :  { %1264 = vpush %v1756_v63  ;;  %v344_v16 = vstv %s1906_s7  ;;  %v369_v24 = vadd.f32 %v367_v54, %v363_v60  ;;  %v390_v13 = vstv %s1944_s13  ;;  %s1972_s18 = spop %1166  ;;  %v254_v45 = vmul.f32 %v1352_v11, %v251_v37 }
  0xd8   :  { %v1354_v6 = vpop.eup %1353  ;;  %1266 = vpush %v815_v27  ;;  %v370_v39 = vadd.f32 %v367_v54, %v364_v33  ;;  %v392_v17 = vmul.f32 %v1726_v14, %v390_v13  ;;  %v393_v52 = vmul.f32 %v1731_v46, %v390_v13  ;;  %s1980_s19 = spop %1168  ;;  %v255_v19 = vadd.f32 %v253_v22, %v224_v1  ;;  %v853_v27 = vpop.permute.xlu0 %852 }
  0xd9   :  { %v1356_v58 = vpop.eup %1355  ;;  %1268 = vpush %v822_v12  ;;  %1365 = vtanh.f32 %v369_v24  ;;  %v398_v21 = vstv %s1951_s14  ;;  %v414_v40 = vstv %s1960_s16  ;;  %s1984_s20 = spop %1170  ;;  %v256_v37 = vadd.f32 %v254_v45, %v225_v44 }
  0xda   :  { %1270 = vpush %v830_v4  ;;  %1367 = vtanh.f32 %v370_v39  ;;  %v394_v53 = vadd.f32 %v392_v17, %v385_v57  ;;  %v395_v0 = vadd.f32 %v393_v52, %v386_v38  ;;  %s1988_s21 = spop %1172  ;;  %v284_v3 = vmul.f32 %v1354_v6, %v282_v20 }
  0xdb   :  { %1272 = vpush %v838_v8  ;;  %v416_v9 = vmul.f32 %v414_v40, %v1705_v35  ;;  %v417_v51 = vmul.f32 %v414_v40, %v1710_v36  ;;  %v421_v5 = vstv %s1965_s17  ;;  %s1997_s22 = spop %1174  ;;  %v285_v4 = vmul.f32 %v1356_v58, %v282_v20  ;;  %v884_v20 = vpop.permute.xlu1 %883 }
  0xdc   :  { %1274 = vpush %v846_v28  ;;  %v400_v18 = vadd.f32 %v398_v21, %v394_v53  ;;  %v401_v25 = vadd.f32 %v398_v21, %v395_v0  ;;  %v423_v8 = vmul.f32 %v1726_v14, %v421_v5  ;;  %s2004_s23 = spop %1176  ;;  %v286_v23 = vadd.f32 %v284_v3, %v255_v19  ;;  %v915_v38 = vpop.permute.xlu0 %914 }
  0xdd   :  { %v1358_v43 = vpop.eup %1357  ;;  %1276 = vpush %v853_v27  ;;  %v424_v50 = vmul.f32 %v1731_v46, %v421_v5  ;;  %v429_v61 = vstv %s1972_s18  ;;  %v445_v48 = vstv %s1984_s20  ;;  %s2009_s24 = spop %1178  ;;  %v287_v10 = vadd.f32 %v285_v4, %v256_v37 }
  0xde   :  { %v1360_v28 = vpop.eup %1359  ;;  %1278 = vpush %v861_v34  ;;  %v315_v15 = vmul.f32 %v1358_v43, %v313_v42  ;;  %1369 = vtanh.f32 %v400_v18  ;;  %v425_v31 = vadd.f32 %v423_v8, %v416_v9  ;;  %s2015_s4 = spop %1180  ;;  %v447_v49 = vmul.f32 %v445_v48, %v1705_v35 }
  0xdf   :  { %1280 = vpush %v869_v59  ;;  %1371 = vtanh.f32 %v401_v25  ;;  %v426_v54 = vadd.f32 %v424_v50, %v417_v51  ;;  %v448_v11 = vmul.f32 %v445_v48, %v1710_v36  ;;  %s2021_s25 = spop %1182  ;;  %v316_v34 = vmul.f32 %v1360_v28, %v313_v42  ;;  %v946_v27 = vpop.permute.xlu1 %945 }
  0xe0   :  { %1282 = vpush %v877_v29  ;;  %v375_v1 = vstv %s1933_s11  ;;  %v431_v44 = vadd.f32 %v429_v61, %v425_v31  ;;  %v452_v60 = vstv %s1988_s21  ;;  %s2029_s26 = spop %1184  ;;  %v317_v59 = vadd.f32 %v315_v15, %v286_v23  ;;  %v977_v50 = vpop.permute.xlu0 %976 }
  0xe1   :  { %1284 = vpush %v884_v20  ;;  %v432_v12 = vadd.f32 %v429_v61, %v426_v54  ;;  %v454_v33 = vmul.f32 %v1726_v14, %v452_v60  ;;  %v455_v57 = vmul.f32 %v1731_v46, %v452_v60  ;;  %s2033_s27 = spop %1186  ;;  %v460_v42 = vstv %s1997_s22 }
  0xe2   :  { %v1362_v29 = vpop.eup %1361  ;;  %1286 = vpush %v892_v62  ;;  %1373 = vtanh.f32 %v431_v44  ;;  %v476_v22 = vstv %s2009_s24  ;;  %v483_v24 = vstv %s2015_s4  ;;  %s2040_s2 = spop %1188  ;;  %v318_v6 = vadd.f32 %v316_v34, %v287_v10 }
  0xe3   :  { %v1364_v13 = vpop.eup %1363  ;;  %1288 = vpush %v900_v7  ;;  %1375 = vtanh.f32 %v432_v12  ;;  %v456_v45 = vadd.f32 %v454_v33, %v447_v49  ;;  %v457_v39 = vadd.f32 %v455_v57, %v448_v11  ;;  %s2044_s1 = spop %1190  ;;  %v346_v62 = vmul.f32 %v1362_v29, %v344_v16  ;;  %v1008_v12 = vpop.permute.xlu1 %1007 }
  0xe4   :  { %1290 = vpush %v908_v30  ;;  %v478_v17 = vmul.f32 %v476_v22, %v1705_v35  ;;  %v479_v52 = vmul.f32 %v476_v22, %v1710_v36  ;;  %v485_v58 = vmul.f32 %v1726_v14, %v483_v24  ;;  %s2053_s3 = spop %1192  ;;  %v347_v7 = vmul.f32 %v1364_v13, %v344_v16 }
  0xe5   :  { %1292 = vpush %v915_v38  ;;  %v462_v19 = vadd.f32 %v460_v42, %v456_v45  ;;  %v463_v21 = vadd.f32 %v460_v42, %v457_v39  ;;  %v486_v30 = vmul.f32 %v1731_v46, %v483_v24  ;;  %s2058_s28 = spop %1194  ;;  %v348_v37 = vadd.f32 %v346_v62, %v317_v59 }
  0xe6   :  { %v1366_v40 = vpop.eup %1365  ;;  %1294 = vpush %v923_v55  ;;  %v406_v53 = vstv %s1958_s15  ;;  %v487_v0 = vadd.f32 %v485_v58, %v478_v17  ;;  %v491_v3 = vstv %s2021_s25  ;;  %s2064_s29 = spop %1196  ;;  %v349_v16 = vadd.f32 %v347_v7, %v318_v6 }
  0xe7   :  { %v1368_v9 = vpop.eup %1367  ;;  %1296 = vpush %v931_v32  ;;  %1377 = vtanh.f32 %v462_v19  ;;  %v488_v51 = vadd.f32 %v486_v30, %v479_v52  ;;  %v507_v5 = vstv %s2033_s27  ;;  %s2069_s30 = spop %1198  ;;  %v2375_v4 = vrot.slane %v1603_v26, 5 }
  0xe8   :  { %v377_v55 = vmul.f32 %v1366_v40, %v375_v1  ;;  %1379 = vtanh.f32 %v463_v21  ;;  %v493_v18 = vadd.f32 %v491_v3, %v487_v0  ;;  %v509_v25 = vmul.f32 %v507_v5, %v1705_v35  ;;  %s2074_s6 = spop %1200 }
  0xe9   :  { %1298 = vpush %v2375_v4  ;;  %v378_v8 = vmul.f32 %v1368_v9, %v375_v1  ;;  %v494_v32 = vadd.f32 %v491_v3, %v488_v51  ;;  %v510_v43 = vmul.f32 %v507_v5, %v1710_v36  ;;  %v514_v23 = vstv %s2040_s2  ;;  %s2078_s7 = spop %1202 }
  0xea   :  { %1300 = vpush %v946_v27  ;;  %v379_v61 = vadd.f32 %v377_v55, %v348_v37  ;;  %1381 = vtanh.f32 %v493_v18  ;;  %v516_v48 = vmul.f32 %v1726_v14, %v514_v23  ;;  %v517_v28 = vmul.f32 %v1731_v46, %v514_v23  ;;  %s2084_s8 = spop %1204  ;;  %v2141_v27 = vld [vmem:[%s2370_s0 + $0x10] sm:$0xff] }
  0xeb   :  { %1302 = vpush %v954_v41  ;;  %v1370_v20 = vpop.eup %1369  ;;  %v380_v10 = vadd.f32 %v378_v8, %v349_v16  ;;  %1383 = vtanh.f32 %v494_v32  ;;  %v522_v15 = vstv %s2044_s1  ;;  %v538_v31 = vstv %s2058_s28  ;;  %s2090_s9 = spop %1206 }
  0xec   :  { %1304 = vpush %v962_v47  ;;  %v1372_v41 = vpop.eup %1371  ;;  %v2376_v54 = vrot.slane %v1603_v26, 6  ;;  %v408_v49 = vmul.f32 %v1370_v20, %v406_v53  ;;  %v518_v11 = vadd.f32 %v516_v48, %v509_v25  ;;  %v519_v34 = vadd.f32 %v517_v28, %v510_v43  ;;  %s2095_s10 = spop %1208 }
  0xed   :  { %v540_v1 = vmul.f32 %v538_v31, %v1705_v35  ;;  %v409_v47 = vmul.f32 %v1372_v41, %v406_v53  ;;  %v437_v44 = vstv %s1980_s19  ;;  %v541_v60 = vmul.f32 %v538_v31, %v1710_v36  ;;  %s2100_s11 = spop %1210 }
  0xee   :  { %1306 = vpush %v2376_v54  ;;  %v545_v59 = vstv %s2064_s29  ;;  %v410_v33 = vadd.f32 %v408_v49, %v379_v61  ;;  %v524_v57 = vadd.f32 %v522_v15, %v518_v11  ;;  %v525_v35 = vadd.f32 %v522_v15, %v519_v34  ;;  %s2105_s12 = spop %1212 }
  0xef   :  { %1308 = vpush %v977_v50  ;;  %v547_v29 = vmul.f32 %v1726_v14, %v545_v59  ;;  %v1374_v38 = vpop.eup %1373  ;;  %v2377_v42 = vrot.slane %v1756_v63, 6  ;;  %v468_v22 = vstv %s2004_s23  ;;  %v548_v36 = vmul.f32 %v1731_v46, %v545_v59  ;;  %s2113_s13 = spop %1214  ;;  %v2122_v46 = vld [vmem:[%s2370_s0] sm:$0xff] }
  0xf0   :  { %1310 = vpush %v985_v2  ;;  %v553_v24 = vstv %s2069_s30  ;;  %v569_v13 = vstv %s2078_s7  ;;  %v1376_v6 = vpop.eup %1375  ;;  %v2378_v2 = vrot.slane %v1603_v26, 7  ;;  %v411_v45 = vadd.f32 %v409_v47, %v380_v10  ;;  %s2117_s14 = spop %1216  ;;  %v2128_v26 = vld [vmem:[%s2370_s0 + $0x8] sm:$0xff] }
  0xf1   :  { %1312 = vpush %v2377_v42  ;;  %v439_v39 = vmul.f32 %v1374_v38, %v437_v44  ;;  %1385 = vtanh.f32 %v524_v57  ;;  %v549_v14 = vadd.f32 %v547_v29, %v540_v1  ;;  %v550_v62 = vadd.f32 %v548_v36, %v541_v60  ;;  %s2131_s19 = spop %1218 }
  0xf2   :  { %1314 = vpush %v2378_v2  ;;  %1387 = vtanh.f32 %v525_v35  ;;  %v571_v17 = vmul.f32 %v2122_v46, %v569_v13  ;;  %v572_v52 = vmul.f32 %v2128_v26, %v569_v13  ;;  %v2379_v58 = vrot.slane %v1743_v56, 7  ;;  %s2136_s20 = spop %1220  ;;  %v2147_v56 = vld [vmem:[%s2370_s0 + $0x18] sm:$0xff] }
  0xf3   :  { %1316 = vpush %v1008_v12  ;;  %v440_v7 = vmul.f32 %v1376_v6, %v437_v44  ;;  %v441_v19 = vadd.f32 %v439_v39, %v410_v33  ;;  %v555_v21 = vadd.f32 %v553_v24, %v549_v14  ;;  %v576_v30 = vstv %s2084_s8  ;;  %s2153_s4 = spop %1222 }
  0xf4   :  { %1318 = vpush %v2379_v58  ;;  %v556_v40 = vadd.f32 %v553_v24, %v550_v62  ;;  %v578_v37 = vmul.f32 %v2141_v27, %v576_v30  ;;  %v579_v53 = vmul.f32 %v2147_v56, %v576_v30  ;;  %v2380_v0 = vrot.slane %v1756_v63, 7  ;;  %v1378_v9 = vpop.eup %1377  ;;  %s2157_s25 = spop %1224 }
  0xf5   :  { %v584_v3 = vstv %s2090_s9  ;;  %v442_v16 = vadd.f32 %v440_v7, %v411_v45  ;;  %1389 = vtanh.f32 %v555_v21  ;;  %v600_v51 = vstv %s2100_s11  ;;  %v1380_v4 = vpop.eup %1379  ;;  %s2159_s0 = spop %1226 }
  0xf6   :  { %1320 = vpush %v2380_v0  ;;  %v607_v5 = vstv %s2105_s12  ;;  %v470_v55 = vmul.f32 %v1378_v9, %v468_v22  ;;  %1391 = vtanh.f32 %v556_v40  ;;  %v580_v18 = vadd.f32 %v578_v37, %v571_v17  ;;  %s2164_s27 = spop %1228 }
  0xf7   :  { %v581_v25 = vadd.f32 %v579_v53, %v572_v52  ;;  %v471_v63 = vmul.f32 %v1380_v4, %v468_v22  ;;  %v602_v8 = vmul.f32 %v2122_v46, %v600_v51  ;;  %v603_v32 = vmul.f32 %v2128_v26, %v600_v51  ;;  %v1382_v23 = vpop.eup %1381  ;;  %s2168_s2 = spop %1230 }
  0xf8   :  { %v609_v43 = vmul.f32 %v2141_v27, %v607_v5  ;;  %v499_v50 = vstv %s2029_s26  ;;  %v586_v61 = vadd.f32 %v584_v3, %v580_v18  ;;  %v610_v28 = vmul.f32 %v2147_v56, %v607_v5  ;;  %v1384_v20 = vpop.eup %1383  ;;  %s2171_s1 = spop %1232 }
  0xf9   :  { %v587_v48 = vadd.f32 %v584_v3, %v581_v25  ;;  %v472_v10 = vadd.f32 %v470_v55, %v441_v19  ;;  %v473_v15 = vadd.f32 %v471_v63, %v442_v16  ;;  %v615_v41 = vstv %s2113_s13  ;;  %s2173_s26 = spop %1234 }
  0xfa   :  { %v611_v31 = vadd.f32 %v609_v43, %v602_v8  ;;  %v501_v54 = vmul.f32 %v1382_v23, %v499_v50  ;;  %1393 = vtanh.f32 %v586_v61  ;;  %v612_v49 = vadd.f32 %v610_v28, %v603_v32  ;;  %s2176_s28 = spop %1236 }
  0xfb   :  { %v502_v11 = vmul.f32 %v1384_v20, %v499_v50  ;;  %1395 = vtanh.f32 %v587_v48  ;;  %v631_v1 = vstv %s2131_s19  ;;  %v530_v47 = vstv %s2053_s3  ;;  %s2181_s29 = spop %1238 }
  0xfc   :  { %v617_v34 = vadd.f32 %v615_v41, %v611_v31  ;;  %v618_v44 = vadd.f32 %v615_v41, %v612_v49  ;;  %v633_v60 = vmul.f32 %v2122_v46, %v631_v1  ;;  %v634_v59 = vmul.f32 %v2128_v26, %v631_v1  ;;  %s2184_s30 = spop %1240 }
  0xfd   :  { %v503_v12 = vadd.f32 %v501_v54, %v472_v10  ;;  %v504_v33 = vadd.f32 %v502_v11, %v473_v15  ;;  %v638_v57 = vstv %s2136_s20  ;;  %v662_v42 = vstv %s2159_s0  ;;  %s2189_s3 = spop %1242 }
  0xfe   :  { %1397 = vtanh.f32 %v617_v34  ;;  %v1386_v35 = vpop.eup %1385  ;;  %v640_v29 = vmul.f32 %v2141_v27, %v638_v57  ;;  %v641_v38 = vmul.f32 %v2147_v56, %v638_v57  ;;  %v646_v36 = vstv %s2153_s4  ;;  %s2195_s7 = spop %1244 }
  0xff   :  { %1399 = vtanh.f32 %v618_v44  ;;  %v1388_v22 = vpop.eup %1387  ;;  %v664_v24 = vmul.f32 %v2122_v46, %v662_v42  ;;  %v665_v13 = vmul.f32 %v2128_v26, %v662_v42  ;;  %v669_v6 = vstv %s2164_s27  ;;  %s2198_s8 = spop %1246 }
 0x100   :  { %v532_v2 = vmul.f32 %v1386_v35, %v530_v47  ;;  %v642_v45 = vadd.f32 %v640_v29, %v633_v60  ;;  %v643_v39 = vadd.f32 %v641_v38, %v634_v59  ;;  %v671_v14 = vmul.f32 %v2141_v27, %v669_v6  ;;  %s2203_s9 = spop %1248 }
 0x101   :  { %v533_v62 = vmul.f32 %v1388_v22, %v530_v47  ;;  %v561_v17 = vstv %s2074_s6  ;;  %v672_v52 = vmul.f32 %v2147_v56, %v669_v6  ;;  %v677_v58 = vstv %s2168_s2  ;;  %s2205_s11 = spop %1250 }
 0x102   :  { %v1390_v7 = vpop.eup %1389  ;;  %v534_v19 = vadd.f32 %v532_v2, %v503_v12  ;;  %v648_v21 = vadd.f32 %v646_v36, %v642_v45  ;;  %v649_v30 = vadd.f32 %v646_v36, %v643_v39  ;;  %v673_v40 = vadd.f32 %v671_v14, %v664_v24  ;;  %s2209_s12 = spop %1252 }
 0x103   :  { %v1392_v37 = vpop.eup %1391  ;;  %v535_v53 = vadd.f32 %v533_v62, %v504_v33  ;;  %v674_v0 = vadd.f32 %v672_v52, %v665_v13  ;;  %v693_v3 = vstv %s2173_s26  ;;  %v700_v9 = vstv %s2176_s28  ;;  %s2212_s6 = spop %1254 }
 0x104   :  { %v563_v16 = vmul.f32 %v1390_v7, %v561_v17  ;;  %1401 = vtanh.f32 %v648_v21  ;;  %v679_v51 = vadd.f32 %v677_v58, %v673_v40  ;;  %v695_v5 = vmul.f32 %v2122_v46, %v693_v3  ;;  %s2215_s13 = spop %1256 }
 0x105   :  { %v564_v4 = vmul.f32 %v1392_v37, %v561_v17  ;;  %1403 = vtanh.f32 %v649_v30  ;;  %v680_v55 = vadd.f32 %v677_v58, %v674_v0  ;;  %v696_v18 = vmul.f32 %v2128_v26, %v693_v3  ;;  %s2220_s15 = spop %1258 }
 0x106   :  { %v592_v25 = vstv %s2095_s10  ;;  %1405 = vtanh.f32 %v679_v51  ;;  %v702_v63 = vmul.f32 %v2141_v27, %v700_v9  ;;  %v703_v8 = vmul.f32 %v2147_v56, %v700_v9  ;;  %s2224_s16 = spop %1260 }
 0x107   :  { %v1394_v32 = vpop.eup %1393  ;;  %v565_v43 = vadd.f32 %v563_v16, %v534_v19  ;;  %v566_v23 = vadd.f32 %v564_v4, %v535_v53  ;;  %v708_v50 = vstv %s2181_s29  ;;  %v724_v61 = vstv %s2189_s3  ;;  %s2227_s10 = spop %1262 }
 0x108   :  { %v1396_v48 = vpop.eup %1395  ;;  %1407 = vtanh.f32 %v680_v55  ;;  %v704_v28 = vadd.f32 %v702_v63, %v695_v5  ;;  %v705_v20 = vadd.f32 %v703_v8, %v696_v18  ;;  %v726_v10 = vmul.f32 %v2122_v46, %v724_v61  ;;  %s2232_s17 = spop %1264 }
 0x109   :  { %v594_v15 = vmul.f32 %v1394_v32, %v592_v25  ;;  %v623_v31 = vstv %s2117_s14  ;;  %v727_v41 = vmul.f32 %v2128_v26, %v724_v61  ;;  %v731_v54 = vstv %s2195_s7  ;;  %s2235_s18 = spop %1266 }
 0x10a   :  { %v595_v11 = vmul.f32 %v1396_v48, %v592_v25  ;;  %v710_v34 = vadd.f32 %v708_v50, %v704_v28  ;;  %v711_v1 = vadd.f32 %v708_v50, %v705_v20  ;;  %v733_v47 = vmul.f32 %v2141_v27, %v731_v54  ;;  %s2240_s14 = spop %1268 }
 0x10b   :  { %v1398_v49 = vpop.eup %1397  ;;  %v596_v60 = vadd.f32 %v594_v15, %v565_v43  ;;  %v654_v59 = vstv %s2157_s25  ;;  %v734_v12 = vmul.f32 %v2147_v56, %v731_v54  ;;  %v739_v33 = vstv %s2198_s8  ;;  %s2243_s19 = spop %1270 }
 0x10c   :  { %v1400_v44 = vpop.eup %1399  ;;  %v597_v57 = vadd.f32 %v595_v11, %v566_v23  ;;  %v625_v35 = vmul.f32 %v1398_v49, %v623_v31  ;;  %v735_v29 = vadd.f32 %v733_v47, %v726_v10  ;;  %v755_v38 = vstv %s2205_s11  ;;  %s2246_s20 = spop %1272 }
 0x10d   :  { %v626_v42 = vmul.f32 %v1400_v44, %v623_v31  ;;  %1409 = vtanh.f32 %v710_v34  ;;  %v736_v22 = vadd.f32 %v734_v12, %v727_v41  ;;  %v757_v36 = vmul.f32 %v2122_v46, %v755_v38  ;;  %s2250_s21 = spop %1274 }
 0x10e   :  { %1411 = vtanh.f32 %v711_v1  ;;  %v741_v24 = vadd.f32 %v739_v33, %v735_v29  ;;  %v758_v13 = vmul.f32 %v2128_v26, %v755_v38  ;;  %v762_v6 = vstv %s2209_s12  ;;  %s2254_s22 = spop %1276 }
 0x10f   :  { %v627_v2 = vadd.f32 %v625_v35, %v596_v60  ;;  %v742_v45 = vadd.f32 %v739_v33, %v736_v22  ;;  %v764_v39 = vmul.f32 %v2141_v27, %v762_v6  ;;  %v765_v14 = vmul.f32 %v2147_v56, %v762_v6  ;;  %s2259_s23 = spop %1278 }
 0x110   :  { %v628_v62 = vadd.f32 %v626_v42, %v597_v57  ;;  %v770_v17 = vstv %s2212_s6  ;;  %v786_v52 = vstv %s2220_s15  ;;  %v793_v58 = vstv %s2224_s16  ;;  %s2262_s24 = spop %1280 }
 0x111   :  { %v1402_v7 = vpop.eup %1401  ;;  %1413 = vtanh.f32 %v741_v24  ;;  %v766_v19 = vadd.f32 %v764_v39, %v757_v36  ;;  %v767_v21 = vadd.f32 %v765_v14, %v758_v13  ;;  %v788_v30 = vmul.f32 %v2122_v46, %v786_v52  ;;  %s2267_s4 = spop %1282 }
 0x112   :  { %v1404_v40 = vpop.eup %1403  ;;  %1415 = vtanh.f32 %v742_v45  ;;  %v789_v37 = vmul.f32 %v2128_v26, %v786_v52  ;;  %v795_v53 = vmul.f32 %v2141_v27, %v793_v58  ;;  %v796_v0 = vmul.f32 %v2147_v56, %v793_v58  ;;  %s2270_s25 = spop %1284 }
 0x113   :  { %v1406_v3 = vpop.eup %1405  ;;  %v656_v9 = vmul.f32 %v1402_v7, %v654_v59  ;;  %v772_v16 = vadd.f32 %v770_v17, %v766_v19  ;;  %v773_v51 = vadd.f32 %v770_v17, %v767_v21  ;;  %v801_v5 = vstv %s2227_s10  ;;  %s2272_s0 = spop %1286 }
 0x114   :  { %v797_v4 = vadd.f32 %v795_v53, %v788_v30  ;;  %v798_v55 = vadd.f32 %v796_v0, %v789_v37  ;;  %v657_v25 = vmul.f32 %v1404_v40, %v654_v59  ;;  %v685_v8 = vstv %s2171_s1  ;;  %s2276_s27 = spop %1288 }
 0x115   :  { %v1408_v18 = vpop.eup %1407  ;;  %v658_v63 = vadd.f32 %v656_v9, %v627_v2  ;;  %v716_v32 = vstv %s2184_s30  ;;  %v687_v43 = vmul.f32 %v1406_v3, %v685_v8  ;;  %1417 = vtanh.f32 %v772_v16  ;;  %s2278_s2 = spop %1290 }
 0x116   :  { %v803_v23 = vadd.f32 %v801_v5, %v797_v4  ;;  %v804_v50 = vadd.f32 %v801_v5, %v798_v55  ;;  %v659_v61 = vadd.f32 %v657_v25, %v628_v62  ;;  %1419 = vtanh.f32 %v773_v51  ;;  %s2285_s1 = spop %1292 }
 0x117   :  { %v817_v48 = vstv %s2235_s18  ;;  %v824_v28 = vstv %s2240_s14  ;;  %v688_v20 = vmul.f32 %v1408_v18, %v685_v8  ;;  %v832_v54 = vstv %s2243_s19  ;;  %s2290_s26 = spop %1294 }
 0x118   :  { %v819_v10 = vmul.f32 %v2122_v46, %v817_v48  ;;  %v820_v15 = vmul.f32 %v2128_v26, %v817_v48  ;;  %v826_v31 = vmul.f32 %v2141_v27, %v824_v28  ;;  %1421 = vtanh.f32 %v803_v23  ;;  %s2296_s28 = spop %1296 }
 0x119   :  { %v827_v41 = vmul.f32 %v2147_v56, %v824_v28  ;;  %v848_v49 = vstv %s2250_s21  ;;  %1423 = vtanh.f32 %v804_v50  ;;  %v689_v60 = vadd.f32 %v687_v43, %v658_v63 }
 0x11a   :  { %v1410_v11 = vpop.eup %1409  ;;  %v828_v34 = vadd.f32 %v826_v31, %v819_v10  ;;  %v850_v1 = vmul.f32 %v2122_v46, %v848_v49  ;;  %v851_v47 = vmul.f32 %v2128_v26, %v848_v49  ;;  %v747_v59 = vstv %s2203_s9  ;;  %s2302_s29 = spop %1298 }
 0x11b   :  { %v1412_v44 = vpop.eup %1411  ;;  %v829_v12 = vadd.f32 %v827_v41, %v820_v15  ;;  %v855_v33 = vstv %s2254_s22  ;;  %v690_v57 = vadd.f32 %v688_v20, %v659_v61  ;;  %v718_v42 = vmul.f32 %v1410_v11, %v716_v32  ;;  %s2307_s30 = spop %1300 }
 0x11c   :  { %v834_v35 = vadd.f32 %v832_v54, %v828_v34  ;;  %v857_v29 = vmul.f32 %v2141_v27, %v855_v33  ;;  %v858_v38 = vmul.f32 %v2147_v56, %v855_v33  ;;  %v863_v36 = vstv %s2259_s23  ;;  %s2310_s3 = spop %1302 }
 0x11d   :  { %v835_v22 = vadd.f32 %v832_v54, %v829_v12  ;;  %v879_v24 = vstv %s2267_s4  ;;  %v719_v6 = vmul.f32 %v1412_v44, %v716_v32  ;;  %v778_v2 = vstv %s2215_s13  ;;  %s2317_s7 = spop %1304 }
 0x11e   :  { %v1414_v13 = vpop.eup %1413  ;;  %v859_v45 = vadd.f32 %v857_v29, %v850_v1  ;;  %v860_v39 = vadd.f32 %v858_v38, %v851_v47  ;;  %v720_v62 = vadd.f32 %v718_v42, %v689_v60  ;;  %1425 = vtanh.f32 %v834_v35 }
 0x11f   :  { %v1416_v14 = vpop.eup %1415  ;;  %v881_v17 = vmul.f32 %v2122_v46, %v879_v24  ;;  %v882_v52 = vmul.f32 %v2128_v26, %v879_v24  ;;  %1427 = vtanh.f32 %v835_v22  ;;  %v886_v19 = vstv %s2270_s25  ;;  %s2322_s8 = spop %1306 }
 0x120   :  { %v865_v58 = vadd.f32 %v863_v36, %v859_v45  ;;  %v866_v7 = vadd.f32 %v863_v36, %v860_v39  ;;  %v721_v21 = vadd.f32 %v719_v6, %v690_v57  ;;  %v749_v30 = vmul.f32 %v1414_v13, %v747_v59  ;;  %s2327_s9 = spop %1308 }
 0x121   :  { %v888_v40 = vmul.f32 %v2141_v27, %v886_v19  ;;  %v889_v37 = vmul.f32 %v2147_v56, %v886_v19  ;;  %v750_v53 = vmul.f32 %v1416_v14, %v747_v59  ;;  %v894_v0 = vstv %s2272_s0  ;;  %s2330_s11 = spop %1310 }
 0x122   :  { %v910_v3 = vstv %s2278_s2  ;;  %v917_v9 = vstv %s2285_s1  ;;  %v1418_v16 = vpop.eup %1417  ;;  %v751_v51 = vadd.f32 %v749_v30, %v720_v62  ;;  %1429 = vtanh.f32 %v865_v58  ;;  %s2335_s12 = spop %1312 }
 0x123   :  { %v890_v5 = vadd.f32 %v888_v40, %v881_v17  ;;  %v891_v4 = vadd.f32 %v889_v37, %v882_v52  ;;  %v1420_v55 = vpop.eup %1419  ;;  %1431 = vtanh.f32 %v866_v7  ;;  %v912_v18 = vmul.f32 %v2122_v46, %v910_v3  ;;  %s2342_s6 = spop %1314 }
 0x124   :  { %v913_v25 = vmul.f32 %v2128_v26, %v910_v3  ;;  %v919_v63 = vmul.f32 %v2141_v27, %v917_v9  ;;  %v752_v8 = vadd.f32 %v750_v53, %v721_v21  ;;  %v920_v23 = vmul.f32 %v2147_v56, %v917_v9  ;;  %s1317_s13 = spop %1316 }
 0x125   :  { %v896_v32 = vadd.f32 %v894_v0, %v890_v5  ;;  %v897_v43 = vadd.f32 %v894_v0, %v891_v4  ;;  %v1422_v50 = vpop.eup %1421  ;;  %v780_v61 = vmul.f32 %v1418_v16, %v778_v2  ;;  %v809_v48 = vstv %s2232_s17  ;;  %s1319_s15 = spop %1318 }
 0x126   :  { %v921_v28 = vadd.f32 %v919_v63, %v912_v18  ;;  %v925_v20 = vstv %s2290_s26  ;;  %v1424_v10 = vpop.eup %1423  ;;  %v781_v15 = vmul.f32 %v1420_v55, %v778_v2  ;;  %v840_v31 = vstv %s2246_s20 }
 0x127   :  { %1433 = vtanh.f32 %v896_v32  ;;  %v922_v41 = vadd.f32 %v920_v23, %v913_v25  ;;  %v782_v54 = vadd.f32 %v780_v61, %v751_v51  ;;  %v941_v11 = vstv %s2302_s29  ;;  %s1321_s16 = spop %1320 }
 0x128   :  { %1435 = vtanh.f32 %v897_v43  ;;  %v927_v49 = vadd.f32 %v925_v20, %v921_v28  ;;  %v783_v34 = vadd.f32 %v781_v15, %v752_v8  ;;  %v943_v47 = vmul.f32 %v2122_v46, %v941_v11 }
 0x129   :  { %v928_v1 = vadd.f32 %v925_v20, %v922_v41  ;;  %v944_v44 = vmul.f32 %v2128_v26, %v941_v11  ;;  %v811_v60 = vmul.f32 %v1422_v50, %v809_v48  ;;  %v812_v59 = vmul.f32 %v1424_v10, %v809_v48 }
 0x12a   :  { %1437 = vtanh.f32 %v927_v49  ;;  %v948_v12 = vstv %s2307_s30  ;;  %v956_v35 = vstv %s2310_s3  ;;  %v972_v29 = vstv %s2322_s8 }
 0x12b   :  { %v950_v33 = vmul.f32 %v2141_v27, %v948_v12  ;;  %v951_v57 = vmul.f32 %v2147_v56, %v948_v12  ;;  %v1426_v38 = vpop.eup %1425  ;;  %1439 = vtanh.f32 %v928_v1  ;;  %v974_v42 = vmul.f32 %v2122_v46, %v972_v29 }
 0x12c   :  { %v975_v22 = vmul.f32 %v2128_v26, %v972_v29  ;;  %v979_v36 = vstv %s2327_s9  ;;  %v1428_v24 = vpop.eup %1427  ;;  %v813_v13 = vadd.f32 %v811_v60, %v782_v54  ;;  %v814_v39 = vadd.f32 %v812_v59, %v783_v34 }
 0x12d   :  { %v952_v6 = vadd.f32 %v950_v33, %v943_v47  ;;  %v953_v2 = vadd.f32 %v951_v57, %v944_v44  ;;  %v981_v45 = vmul.f32 %v2141_v27, %v979_v36  ;;  %v871_v14 = vstv %s2262_s24 }
 0x12e   :  { %v982_v62 = vmul.f32 %v2147_v56, %v979_v36  ;;  %v987_v17 = vstv %s2330_s11  ;;  %v842_v52 = vmul.f32 %v1426_v38, %v840_v31  ;;  %v843_v30 = vmul.f32 %v1428_v24, %v840_v31 }
 0x12f   :  { %v958_v58 = vadd.f32 %v956_v35, %v952_v6  ;;  %v959_v7 = vadd.f32 %v956_v35, %v953_v2  ;;  %v983_v19 = vadd.f32 %v981_v45, %v974_v42  ;;  %v1430_v21 = vpop.eup %1429  ;;  %v1003_v37 = vstv %s2342_s6 }
 0x130   :  { %v984_v40 = vadd.f32 %v982_v62, %v975_v22  ;;  %v1010_v53 = vstv %s1317_s13  ;;  %v1432_v0 = vpop.eup %1431  ;;  %v844_v3 = vadd.f32 %v842_v52, %v813_v13  ;;  %v1005_v16 = vmul.f32 %v2122_v46, %v1003_v37 }
 0x131   :  { %1441 = vtanh.f32 %v958_v58  ;;  %v989_v9 = vadd.f32 %v987_v17, %v983_v19  ;;  %v845_v51 = vadd.f32 %v843_v30, %v814_v39  ;;  %v1006_v4 = vmul.f32 %v2128_v26, %v1003_v37  ;;  %v1039_v39 = vpop.permute.xlu0 %1038 }
 0x132   :  { %1443 = vtanh.f32 %v959_v7  ;;  %v990_v5 = vadd.f32 %v987_v17, %v984_v40  ;;  %v873_v55 = vmul.f32 %v1430_v21, %v871_v14  ;;  %v1012_v18 = vmul.f32 %v2141_v27, %v1010_v53 }
 0x133   :  { %1445 = vtanh.f32 %v989_v9  ;;  %v1013_v25 = vmul.f32 %v2147_v56, %v1010_v53  ;;  %v874_v8 = vmul.f32 %v1432_v0, %v871_v14  ;;  %v1018_v32 = vstv %s1319_s15 }
 0x134   :  { %v1434_v63 = vpop.eup %1433  ;;  %1447 = vtanh.f32 %v990_v5  ;;  %v875_v46 = vadd.f32 %v873_v55, %v844_v3  ;;  %v1014_v23 = vadd.f32 %v1012_v18, %v1005_v16  ;;  %v902_v48 = vstv %s2276_s27 }
 0x135   :  { %v1436_v43 = vpop.eup %1435  ;;  %v1015_v50 = vadd.f32 %v1013_v25, %v1006_v4  ;;  %v876_v61 = vadd.f32 %v874_v8, %v845_v51  ;;  %v904_v26 = vmul.f32 %v1434_v63, %v902_v48  ;;  %v933_v41 = vstv %s2296_s28 }
 0x136   :  { %v1020_v20 = vadd.f32 %v1018_v32, %v1014_v23  ;;  %v905_v15 = vmul.f32 %v1436_v43, %v902_v48  ;;  %v964_v47 = vstv %s2317_s7  ;;  %v995_v29 = vstv %s2335_s12 }
 0x137   :  { %v1438_v28 = vpop.eup %1437  ;;  %v1021_v10 = vadd.f32 %v1018_v32, %v1015_v50  ;;  %v906_v31 = vadd.f32 %v904_v26, %v875_v46  ;;  %v1026_v22 = vstv %s1321_s16 }
 0x138   :  { %v1440_v27 = vpop.eup %1439  ;;  %1449 = vtanh.f32 %v1020_v20  ;;  %v907_v56 = vadd.f32 %v905_v15, %v876_v61  ;;  %v935_v54 = vmul.f32 %v1438_v28, %v933_v41 }
 0x139   :  { %1451 = vtanh.f32 %v1021_v10  ;;  %v936_v49 = vmul.f32 %v1440_v27, %v933_v41 }
 0x13a   :  { %v937_v11 = vadd.f32 %v935_v54, %v906_v31 }
 0x13b   :  { %v938_v1 = vadd.f32 %v936_v49, %v907_v56 }
 0x13e   :  { %v1442_v34 = vpop.eup %1441 }
 0x13f   :  { %v1444_v44 = vpop.eup %1443  ;;  %v966_v60 = vmul.f32 %v1442_v34, %v964_v47 }
 0x140   :  { %v1446_v59 = vpop.eup %1445  ;;  %v967_v12 = vmul.f32 %v1444_v44, %v964_v47 }
 0x141   :  { %v1448_v33 = vpop.eup %1447  ;;  %v968_v57 = vadd.f32 %v966_v60, %v937_v11  ;;  %v997_v38 = vmul.f32 %v1446_v59, %v995_v29 }
 0x142   :  { %v969_v35 = vadd.f32 %v967_v12, %v938_v1  ;;  %v998_v42 = vmul.f32 %v1448_v33, %v995_v29 }
 0x143   :  { %v999_v36 = vadd.f32 %v997_v38, %v968_v57 }
 0x144   :  { %v1000_v13 = vadd.f32 %v998_v42, %v969_v35 }
 0x145   :  { %v1450_v24 = vpop.eup %1449 }
 0x146   :  { %v1452_v6 = vpop.eup %1451  ;;  %v1028_v2 = vmul.f32 %v1450_v24, %v1026_v22 }
 0x147   :  { %v1029_v45 = vmul.f32 %v1452_v6, %v1026_v22 }
 0x148   :  { %v1030_v14 = vadd.f32 %v1028_v2, %v999_v36 }
 0x149   :  { %v1031_v62 = vadd.f32 %v1029_v45, %v1000_v13 }
 0x14a   :  { %v1041_v17 = vadd.f32 %v1039_v39, %v1030_v14 }
 0x14b   :  { %v1042_v52 = vadd.f32 %v1039_v39, %v1031_v62 }
 0x14c   :  { %v1064_v58 = vmul.f32 -1.442695, %v1041_v17 }
 0x14d   :  { %v1065_v7 = vmul.f32 -1.442695, %v1042_v52 }
 0x14e   :  { %1453 = vpow2.f32 %v1064_v58 }
 0x14f   :  { %1455 = vpow2.f32 %v1065_v7 }
 0x15b   :  { %v1454_v19 = vpop.eup %1453 }
 0x15c   :  { %v1456_v21 = vpop.eup %1455  ;;  %v1049_v30 = vadd.f32 1.0, %v1454_v19 }
 0x15d   :  { %v1050_v40 = vadd.f32 1.0, %v1456_v21 }
 0x15e   :  { %1457 = vrcp.f32 %v1049_v30 }
 0x15f   :  { %1459 = vrcp.f32 %v1050_v40 }
 0x16b   :  { %v1458_v37 = vpop.eup %1457 }
 0x16c   :  { %v1460_v53 = vpop.eup %1459  ;;  %1055 = vst [vmem:[%s2371_s5] sm:$0xff] %v1458_v37 }
 0x16d   :  { %1056 = vst [vmem:[%s2371_s5 + $0x8] sm:$0xff] %v1460_v53 }

</bundles_post_ra>
